<compile_context>
chip_gen: v5e
topology: v5e:2x2
jax: 0.10.0
libtpu: 0.0.40
codegen_flags: <defaults>
</compile_context>

<pallas_src>
import jax
import jax.numpy as jnp
from jax.experimental import pallas as pl
from jax.experimental.pallas import tpu as pltpu


# ----------------------------------------------------------------------------
# Fused kernel: conv3x3 (in-kernel im2col) + bias + ReLU + GAP + fc epilogue.
# One batch element per grid step.
# ----------------------------------------------------------------------------
def _fused_conv_gap_fc_kernel(x_ref, w_ref, cb_ref, fcw_ref, fcb_ref,
                              feat_ref, logit_ref):
    # x_ref    : (H+2, W+2, Cin)  bf16  zero-padded NHWC image (1-px halo)
    # w_ref    : (9, Cin, Cout)   bf16  conv weights, tap-major (kh*3 + kw)
    # cb_ref   : (1, Cout)        f32   conv bias
    # fcw_ref  : (Cout, C)        f32   fc weights (the hooked layer)
    # fcb_ref  : (1, C)           f32   fc bias
    # feat_ref : (1, Cout)        f32   hooked features (GAP of conv output)
    # logit_ref: (1, C)           f32   fc output (computed; caller discards)
    Hp, Wp, Cin = x_ref.shape
    H, W = Hp - 2, Wp - 2
    Cout = w_ref.shape[-1]

    x = x_ref[...]                                        # padded tile, bf16
    acc = jnp.zeros((H * W, Cout), jnp.float32)           # f32 accumulator

    # In-kernel im2col: 9 static shifted slices, one small MXU dot per tap,
    # accumulated in f32.
    for kh in range(3):
        for kw in range(3):
            tap = kh * 3 + kw
            xt = x[kh:kh + H, kw:kw + W, :].reshape(H * W, Cin)
            acc = acc + jnp.dot(xt, w_ref[tap],
                                preferred_element_type=jnp.float32)

    y = jnp.maximum(acc + cb_ref[...], 0.0)               # bias + ReLU (f32)

    # Global average pool: running sum + single multiply by 1/HW.
    feat = jnp.sum(y, axis=0, keepdims=True) * (1.0 / (H * W))   # (1, Cout)
    feat_ref[...] = feat

    # fc epilogue (the hooked layer) — fused so "model(x) runs fully" holds and
    # the fc compute cannot be dead-code-eliminated as a separate call.
    logit_ref[...] = (
        jnp.dot(feat, fcw_ref[...], preferred_element_type=jnp.float32)
        + fcb_ref[...]
    )


def model_feats_forward(x_nchw, params):
    """Equivalent of Model_feats.forward: run the backbone, return the hooked
    features (the input to the fc layer)."""
    B, Cin, H, W = x_nchw.shape
    conv_w = params["conv_w"]                 # (3, 3, Cin, Cout)
    Cout = conv_w.shape[-1]
    fc_w = params["fc_w"]                     # (Cout, C)
    C = fc_w.shape[-1]
    Hp, Wp = H + 2, W + 2

    # Glue: NCHW -> NHWC, zero-pad the 1-px halo (3x3, stride 1, pad 1), and
    # cast the memory-dominant streams (image + conv weights) to bf16.
    x = jnp.transpose(x_nchw, (0, 2, 3, 1))
    xp = jnp.pad(x, ((0, 0), (1, 1), (1, 1), (0, 0))).astype(jnp.bfloat16)
    w_taps = conv_w.reshape(9, Cin, Cout).astype(jnp.bfloat16)
    cb = params["conv_b"].reshape(1, Cout).astype(jnp.float32)
    fcw = fc_w.astype(jnp.float32)
    fcb = params["fc_b"].reshape(1, C).astype(jnp.float32)

    feats, _logits = pl.pallas_call(
        _fused_conv_gap_fc_kernel,
        out_shape=(
            jax.ShapeDtypeStruct((B, 1, Cout), jnp.float32),   # hooked feats
            jax.ShapeDtypeStruct((B, 1, C), jnp.float32),      # fc output
        ),
        grid=(B,),
        in_specs=[
            pl.BlockSpec((pl.Squeezed(), Hp, Wp, Cin), lambda b: (b, 0, 0, 0)),
            pl.BlockSpec((9, Cin, Cout), lambda b: (0, 0, 0)),
            pl.BlockSpec((1, Cout), lambda b: (0, 0)),
            pl.BlockSpec((Cout, C), lambda b: (0, 0)),
            pl.BlockSpec((1, C), lambda b: (0, 0)),
        ],
        out_specs=(
            pl.BlockSpec((pl.Squeezed(), 1, Cout), lambda b: (b, 0, 0)),
            pl.BlockSpec((pl.Squeezed(), 1, C), lambda b: (b, 0, 0)),
        ),
        compiler_params=pltpu.CompilerParams(
            dimension_semantics=("parallel",),   # megacore batch sharding (v7x)
        ),
    )(xp, w_taps, cb, fcw, fcb)

    # Model_feats.forward returns the hook-captured fc input; the fc output is
    # computed inside the same kernel but discarded here.
    return feats.reshape(B, Cout)


if __name__ == "__main__":
    # Small shapes consistent with the module: batch=2, channels=4, spatial=16.
    # feat_size=128 (lane-dense stand-in for the default 4096), classes=8.
    B, Cin, H, W = 2, 4, 16, 16
    FEAT_SIZE, NUM_CLASSES = 128, 8

    key = jax.random.PRNGKey(0)
    kx, kw1, kb1, kw2, kb2 = jax.random.split(key, 5)

    x = jax.random.normal(kx, (B, Cin, H, W), dtype=jnp.float32)
    params = {
        "conv_w": jax.random.normal(kw1, (3, 3, Cin, FEAT_SIZE), dtype=jnp.float32) * 0.1,
        "conv_b": jax.random.normal(kb1, (FEAT_SIZE,), dtype=jnp.float32) * 0.1,
        "fc_w": jax.random.normal(kw2, (FEAT_SIZE, NUM_CLASSES), dtype=jnp.float32) * 0.1,
        "fc_b": jax.random.normal(kb2, (NUM_CLASSES,), dtype=jnp.float32) * 0.1,
    }

    feats = jax.block_until_ready(model_feats_forward(x, params))

    # Pure-JAX reference for the hooked features, using the same bf16
    # quantization of the conv input/weights as the kernel (f32 accumulation).
    xb = jnp.transpose(x, (0, 2, 3, 1)).astype(jnp.bfloat16).astype(jnp.float32)
    wb = params["conv_w"].astype(jnp.bfloat16).astype(jnp.float32)
    xp_ref = jnp.pad(xb, ((0, 0), (1, 1), (1, 1), (0, 0)))
    patches_ref = jnp.concatenate(
        [xp_ref[:, kh:kh + H, kw:kw + W, :] for kh in range(3) for kw in range(3)],
        axis=-1,
    ).reshape(B, H * W, 9 * Cin)
    y_ref = jnp.maximum(
        jnp.einsum(
            "bpk,kc->bpc",
            patches_ref,
            wb.reshape(9 * Cin, FEAT_SIZE),
            precision=jax.lax.Precision.HIGHEST,
        )
        + params["conv_b"],
        0.0,
    )
    feats_ref = jnp.mean(y_ref, axis=1)

    assert feats.shape == (B, FEAT_SIZE)
    assert jnp.allclose(feats, feats_ref, rtol=1e-4, atol=1e-4), \
        float(jnp.max(jnp.abs(feats - feats_ref)))
    print("KERNEL_OK")
</pallas_src>

<mosaic_0001>
module attributes {stable_mosaic.version = 11 : i64} {
  func.func @_fused_conv_gap_fc_kernel(%arg0: i32, %arg1: memref<1x18x18x4xbf16, #tpu.memory_space<vmem>>, %arg2: memref<9x4x128xbf16, #tpu.memory_space<vmem>>, %arg3: memref<1x128xf32, #tpu.memory_space<vmem>>, %arg4: memref<128x8xf32, #tpu.memory_space<vmem>>, %arg5: memref<1x8xf32, #tpu.memory_space<vmem>>, %arg6: memref<1x1x128xf32, #tpu.memory_space<vmem>>, %arg7: memref<1x1x8xf32, #tpu.memory_space<vmem>>) attributes {dimension_semantics = [#tpu.dimension_semantics<parallel>], iteration_bounds = array<i64: 2>, scalar_prefetch = 0 : i64, scratch_operands = 0 : i64, tpu.core_type = #tpu.core_type<tc>, window_params = [{transform_indices = @transform_0, window_bounds = array<i64: 1, 18, 18, 4>}, {pipeline_mode = #tpu.pipeline_mode<synchronous>, transform_indices = @transform_1, window_bounds = array<i64: 9, 4, 128>}, {pipeline_mode = #tpu.pipeline_mode<synchronous>, transform_indices = @transform_2, window_bounds = array<i64: 1, 128>}, {pipeline_mode = #tpu.pipeline_mode<synchronous>, transform_indices = @transform_3, window_bounds = array<i64: 128, 8>}, {pipeline_mode = #tpu.pipeline_mode<synchronous>, transform_indices = @transform_4, window_bounds = array<i64: 1, 8>}, {transform_indices = @transform_5, window_bounds = array<i64: 1, 1, 128>}, {transform_indices = @transform_6, window_bounds = array<i64: 1, 1, 8>}]} {
    %c0 = arith.constant 0 : index
    %c0_0 = arith.constant 0 : index
    %c0_1 = arith.constant 0 : index
    %c0_2 = arith.constant 0 : index
    %0 = vector.load %arg1[%c0, %c0_0, %c0_1, %c0_2] : memref<1x18x18x4xbf16, #tpu.memory_space<vmem>>, vector<1x18x18x4xbf16>
    %1 = vector.shape_cast %0 : vector<1x18x18x4xbf16> to vector<18x18x4xbf16>
    %cst = arith.constant 0.000000e+00 : f32
    %2 = vector.broadcast %cst : f32 to vector<256x128xf32>
    %3 = vector.extract_strided_slice %1 {offsets = [0, 0, 0], sizes = [16, 16, 4], strides = [1, 1, 1]} : vector<18x18x4xbf16> to vector<16x16x4xbf16>
    %4 = vector.shape_cast %3 : vector<16x16x4xbf16> to vector<256x4xbf16>
    %c0_3 = arith.constant 0 : index
    %c0_4 = arith.constant 0 : index
    %c0_5 = arith.constant 0 : index
    %5 = vector.load %arg2[%c0_3, %c0_4, %c0_5] : memref<9x4x128xbf16, #tpu.memory_space<vmem>>, vector<1x4x128xbf16>
    %6 = vector.shape_cast %5 : vector<1x4x128xbf16> to vector<4x128xbf16>
    %cst_6 = arith.constant dense<0.000000e+00> : vector<256x128xf32>
    %7 = tpu.matmul %4, %6, %cst_6 {dimension_numbers = #tpu.dot_dimension_numbers<[1], [0], [0], [1], [0, 0, 1, 1], [], []>} : vector<256x4xbf16>, vector<4x128xbf16>, vector<256x128xf32> -> vector<256x128xf32>
    %8 = arith.addf %2, %7 : vector<256x128xf32>
    %9 = vector.extract_strided_slice %1 {offsets = [0, 1, 0], sizes = [16, 16, 4], strides = [1, 1, 1]} : vector<18x18x4xbf16> to vector<16x16x4xbf16>
    %10 = vector.shape_cast %9 : vector<16x16x4xbf16> to vector<256x4xbf16>
    %c1 = arith.constant 1 : index
    %c0_7 = arith.constant 0 : index
    %c0_8 = arith.constant 0 : index
    %11 = vector.load %arg2[%c1, %c0_7, %c0_8] : memref<9x4x128xbf16, #tpu.memory_space<vmem>>, vector<1x4x128xbf16>
    %12 = vector.shape_cast %11 : vector<1x4x128xbf16> to vector<4x128xbf16>
    %cst_9 = arith.constant dense<0.000000e+00> : vector<256x128xf32>
    %13 = tpu.matmul %10, %12, %cst_9 {dimension_numbers = #tpu.dot_dimension_numbers<[1], [0], [0], [1], [0, 0, 1, 1], [], []>} : vector<256x4xbf16>, vector<4x128xbf16>, vector<256x128xf32> -> vector<256x128xf32>
    %14 = arith.addf %8, %13 : vector<256x128xf32>
    %15 = vector.extract_strided_slice %1 {offsets = [0, 2, 0], sizes = [16, 16, 4], strides = [1, 1, 1]} : vector<18x18x4xbf16> to vector<16x16x4xbf16>
    %16 = vector.shape_cast %15 : vector<16x16x4xbf16> to vector<256x4xbf16>
    %c2 = arith.constant 2 : index
    %c0_10 = arith.constant 0 : index
    %c0_11 = arith.constant 0 : index
    %17 = vector.load %arg2[%c2, %c0_10, %c0_11] : memref<9x4x128xbf16, #tpu.memory_space<vmem>>, vector<1x4x128xbf16>
    %18 = vector.shape_cast %17 : vector<1x4x128xbf16> to vector<4x128xbf16>
    %cst_12 = arith.constant dense<0.000000e+00> : vector<256x128xf32>
    %19 = tpu.matmul %16, %18, %cst_12 {dimension_numbers = #tpu.dot_dimension_numbers<[1], [0], [0], [1], [0, 0, 1, 1], [], []>} : vector<256x4xbf16>, vector<4x128xbf16>, vector<256x128xf32> -> vector<256x128xf32>
    %20 = arith.addf %14, %19 : vector<256x128xf32>
    %21 = vector.extract_strided_slice %1 {offsets = [1, 0, 0], sizes = [16, 16, 4], strides = [1, 1, 1]} : vector<18x18x4xbf16> to vector<16x16x4xbf16>
    %22 = vector.shape_cast %21 : vector<16x16x4xbf16> to vector<256x4xbf16>
    %c3 = arith.constant 3 : index
    %c0_13 = arith.constant 0 : index
    %c0_14 = arith.constant 0 : index
    %23 = vector.load %arg2[%c3, %c0_13, %c0_14] : memref<9x4x128xbf16, #tpu.memory_space<vmem>>, vector<1x4x128xbf16>
    %24 = vector.shape_cast %23 : vector<1x4x128xbf16> to vector<4x128xbf16>
    %cst_15 = arith.constant dense<0.000000e+00> : vector<256x128xf32>
    %25 = tpu.matmul %22, %24, %cst_15 {dimension_numbers = #tpu.dot_dimension_numbers<[1], [0], [0], [1], [0, 0, 1, 1], [], []>} : vector<256x4xbf16>, vector<4x128xbf16>, vector<256x128xf32> -> vector<256x128xf32>
    %26 = arith.addf %20, %25 : vector<256x128xf32>
    %27 = vector.extract_strided_slice %1 {offsets = [1, 1, 0], sizes = [16, 16, 4], strides = [1, 1, 1]} : vector<18x18x4xbf16> to vector<16x16x4xbf16>
    %28 = vector.shape_cast %27 : vector<16x16x4xbf16> to vector<256x4xbf16>
    %c4 = arith.constant 4 : index
    %c0_16 = arith.constant 0 : index
    %c0_17 = arith.constant 0 : index
    %29 = vector.load %arg2[%c4, %c0_16, %c0_17] : memref<9x4x128xbf16, #tpu.memory_space<vmem>>, vector<1x4x128xbf16>
    %30 = vector.shape_cast %29 : vector<1x4x128xbf16> to vector<4x128xbf16>
    %cst_18 = arith.constant dense<0.000000e+00> : vector<256x128xf32>
    %31 = tpu.matmul %28, %30, %cst_18 {dimension_numbers = #tpu.dot_dimension_numbers<[1], [0], [0], [1], [0, 0, 1, 1], [], []>} : vector<256x4xbf16>, vector<4x128xbf16>, vector<256x128xf32> -> vector<256x128xf32>
    %32 = arith.addf %26, %31 : vector<256x128xf32>
    %33 = vector.extract_strided_slice %1 {offsets = [1, 2, 0], sizes = [16, 16, 4], strides = [1, 1, 1]} : vector<18x18x4xbf16> to vector<16x16x4xbf16>
    %34 = vector.shape_cast %33 : vector<16x16x4xbf16> to vector<256x4xbf16>
    %c5 = arith.constant 5 : index
    %c0_19 = arith.constant 0 : index
    %c0_20 = arith.constant 0 : index
    %35 = vector.load %arg2[%c5, %c0_19, %c0_20] : memref<9x4x128xbf16, #tpu.memory_space<vmem>>, vector<1x4x128xbf16>
    %36 = vector.shape_cast %35 : vector<1x4x128xbf16> to vector<4x128xbf16>
    %cst_21 = arith.constant dense<0.000000e+00> : vector<256x128xf32>
    %37 = tpu.matmul %34, %36, %cst_21 {dimension_numbers = #tpu.dot_dimension_numbers<[1], [0], [0], [1], [0, 0, 1, 1], [], []>} : vector<256x4xbf16>, vector<4x128xbf16>, vector<256x128xf32> -> vector<256x128xf32>
    %38 = arith.addf %32, %37 : vector<256x128xf32>
    %39 = vector.extract_strided_slice %1 {offsets = [2, 0, 0], sizes = [16, 16, 4], strides = [1, 1, 1]} : vector<18x18x4xbf16> to vector<16x16x4xbf16>
    %40 = vector.shape_cast %39 : vector<16x16x4xbf16> to vector<256x4xbf16>
    %c6 = arith.constant 6 : index
    %c0_22 = arith.constant 0 : index
    %c0_23 = arith.constant 0 : index
    %41 = vector.load %arg2[%c6, %c0_22, %c0_23] : memref<9x4x128xbf16, #tpu.memory_space<vmem>>, vector<1x4x128xbf16>
    %42 = vector.shape_cast %41 : vector<1x4x128xbf16> to vector<4x128xbf16>
    %cst_24 = arith.constant dense<0.000000e+00> : vector<256x128xf32>
    %43 = tpu.matmul %40, %42, %cst_24 {dimension_numbers = #tpu.dot_dimension_numbers<[1], [0], [0], [1], [0, 0, 1, 1], [], []>} : vector<256x4xbf16>, vector<4x128xbf16>, vector<256x128xf32> -> vector<256x128xf32>
    %44 = arith.addf %38, %43 : vector<256x128xf32>
    %45 = vector.extract_strided_slice %1 {offsets = [2, 1, 0], sizes = [16, 16, 4], strides = [1, 1, 1]} : vector<18x18x4xbf16> to vector<16x16x4xbf16>
    %46 = vector.shape_cast %45 : vector<16x16x4xbf16> to vector<256x4xbf16>
    %c7 = arith.constant 7 : index
    %c0_25 = arith.constant 0 : index
    %c0_26 = arith.constant 0 : index
    %47 = vector.load %arg2[%c7, %c0_25, %c0_26] : memref<9x4x128xbf16, #tpu.memory_space<vmem>>, vector<1x4x128xbf16>
    %48 = vector.shape_cast %47 : vector<1x4x128xbf16> to vector<4x128xbf16>
    %cst_27 = arith.constant dense<0.000000e+00> : vector<256x128xf32>
    %49 = tpu.matmul %46, %48, %cst_27 {dimension_numbers = #tpu.dot_dimension_numbers<[1], [0], [0], [1], [0, 0, 1, 1], [], []>} : vector<256x4xbf16>, vector<4x128xbf16>, vector<256x128xf32> -> vector<256x128xf32>
    %50 = arith.addf %44, %49 : vector<256x128xf32>
    %51 = vector.extract_strided_slice %1 {offsets = [2, 2, 0], sizes = [16, 16, 4], strides = [1, 1, 1]} : vector<18x18x4xbf16> to vector<16x16x4xbf16>
    %52 = vector.shape_cast %51 : vector<16x16x4xbf16> to vector<256x4xbf16>
    %c8 = arith.constant 8 : index
    %c0_28 = arith.constant 0 : index
    %c0_29 = arith.constant 0 : index
    %53 = vector.load %arg2[%c8, %c0_28, %c0_29] : memref<9x4x128xbf16, #tpu.memory_space<vmem>>, vector<1x4x128xbf16>
    %54 = vector.shape_cast %53 : vector<1x4x128xbf16> to vector<4x128xbf16>
    %cst_30 = arith.constant dense<0.000000e+00> : vector<256x128xf32>
    %55 = tpu.matmul %52, %54, %cst_30 {dimension_numbers = #tpu.dot_dimension_numbers<[1], [0], [0], [1], [0, 0, 1, 1], [], []>} : vector<256x4xbf16>, vector<4x128xbf16>, vector<256x128xf32> -> vector<256x128xf32>
    %56 = arith.addf %50, %55 : vector<256x128xf32>
    %c0_31 = arith.constant 0 : index
    %c0_32 = arith.constant 0 : index
    %57 = vector.load %arg3[%c0_31, %c0_32] : memref<1x128xf32, #tpu.memory_space<vmem>>, vector<1x128xf32>
    %58 = vector.broadcast %57 : vector<1x128xf32> to vector<256x128xf32>
    %59 = arith.addf %56, %58 : vector<256x128xf32>
    %cst_33 = arith.constant 0.000000e+00 : f32
    %60 = vector.broadcast %cst_33 : f32 to vector<256x128xf32>
    %61 = arith.maximumf %59, %60 : vector<256x128xf32>
    %cst_34 = arith.constant dense<0.000000e+00> : vector<128xf32>
    %62 = vector.multi_reduction <add>, %61, %cst_34 [0] : vector<256x128xf32> to vector<128xf32>
    %63 = vector.shape_cast %62 : vector<128xf32> to vector<1x128xf32>
    %cst_35 = arith.constant 3.906250e-03 : f32
    %64 = vector.broadcast %cst_35 : f32 to vector<1x128xf32>
    %65 = arith.mulf %63, %64 : vector<1x128xf32>
    %c0_36 = arith.constant 0 : index
    %c0_37 = arith.constant 0 : index
    %c0_38 = arith.constant 0 : index
    %66 = vector.load %arg6[%c0_36, %c0_37, %c0_38] : memref<1x1x128xf32, #tpu.memory_space<vmem>>, vector<1x1x128xf32>
    %67 = vector.shape_cast %66 : vector<1x1x128xf32> to vector<1x128xf32>
    %68 = vector.shape_cast %65 : vector<1x128xf32> to vector<1x1x128xf32>
    tpu.vector_store %arg6[%c0_36, %c0_37, %c0_38], %68 {strides = array<i32>} : memref<1x1x128xf32, #tpu.memory_space<vmem>>, vector<1x1x128xf32>,
    %c0_39 = arith.constant 0 : index
    %c0_40 = arith.constant 0 : index
    %69 = vector.load %arg4[%c0_39, %c0_40] : memref<128x8xf32, #tpu.memory_space<vmem>>, vector<128x8xf32>
    %cst_41 = arith.constant dense<0.000000e+00> : vector<1x8xf32>
    %70 = tpu.matmul %65, %69, %cst_41 {dimension_numbers = #tpu.dot_dimension_numbers<[1], [0], [0], [1], [0, 0, 1, 1], [], []>} : vector<1x128xf32>, vector<128x8xf32>, vector<1x8xf32> -> vector<1x8xf32>
    %c0_42 = arith.constant 0 : index
    %c0_43 = arith.constant 0 : index
    %71 = vector.load %arg5[%c0_42, %c0_43] : memref<1x8xf32, #tpu.memory_space<vmem>>, vector<1x8xf32>
    %72 = arith.addf %70, %71 : vector<1x8xf32>
    %c0_44 = arith.constant 0 : index
    %c0_45 = arith.constant 0 : index
    %c0_46 = arith.constant 0 : index
    %73 = vector.load %arg7[%c0_44, %c0_45, %c0_46] : memref<1x1x8xf32, #tpu.memory_space<vmem>>, vector<1x1x8xf32>
    %74 = vector.shape_cast %73 : vector<1x1x8xf32> to vector<1x8xf32>
    %75 = vector.shape_cast %72 : vector<1x8xf32> to vector<1x1x8xf32>
    tpu.vector_store %arg7[%c0_44, %c0_45, %c0_46], %75 {strides = array<i32>} : memref<1x1x8xf32, #tpu.memory_space<vmem>>, vector<1x1x8xf32>,
    return
  }
  func.func @transform_0(%arg0: i32) -> (i32, i32, i32, i32) {
    %c0_i32 = arith.constant 0 : i32
    %c0_i32_0 = arith.constant 0 : i32
    %c0_i32_1 = arith.constant 0 : i32
    %c0_i32_2 = arith.constant 0 : i32
    return %arg0, %c0_i32, %c0_i32_0, %c0_i32_1 : i32, i32, i32, i32
  }
  func.func @transform_1(%arg0: i32) -> (i32, i32, i32) {
    %c0_i32 = arith.constant 0 : i32
    %c0_i32_0 = arith.constant 0 : i32
    %c0_i32_1 = arith.constant 0 : i32
    %c0_i32_2 = arith.constant 0 : i32
    return %c0_i32, %c0_i32_0, %c0_i32_1 : i32, i32, i32
  }
  func.func @transform_2(%arg0: i32) -> (i32, i32) {
    %c0_i32 = arith.constant 0 : i32
    %c0_i32_0 = arith.constant 0 : i32
    %c0_i32_1 = arith.constant 0 : i32
    return %c0_i32, %c0_i32_0 : i32, i32
  }
  func.func @transform_3(%arg0: i32) -> (i32, i32) {
    %c0_i32 = arith.constant 0 : i32
    %c0_i32_0 = arith.constant 0 : i32
    %c0_i32_1 = arith.constant 0 : i32
    return %c0_i32, %c0_i32_0 : i32, i32
  }
  func.func @transform_4(%arg0: i32) -> (i32, i32) {
    %c0_i32 = arith.constant 0 : i32
    %c0_i32_0 = arith.constant 0 : i32
    %c0_i32_1 = arith.constant 0 : i32
    return %c0_i32, %c0_i32_0 : i32, i32
  }
  func.func @transform_5(%arg0: i32) -> (i32, i32, i32) {
    %c0_i32 = arith.constant 0 : i32
    %c0_i32_0 = arith.constant 0 : i32
    %c0_i32_1 = arith.constant 0 : i32
    return %arg0, %c0_i32, %c0_i32_0 : i32, i32, i32
  }
  func.func @transform_6(%arg0: i32) -> (i32, i32, i32) {
    %c0_i32 = arith.constant 0 : i32
    %c0_i32_0 = arith.constant 0 : i32
    %c0_i32_1 = arith.constant 0 : i32
    return %arg0, %c0_i32, %c0_i32_0 : i32, i32, i32
  }
}

</mosaic_0001>

<bundles_post_ra>
// kernel: tpu_custom_call.1
= control target key start
LH: loop header
LB: loop body
LE: loop exit
PB: predicated region body
PF: predicated region fallthrough
CT: control target
= control target key end

     0   :  { %12 = vsyncpa [#allocation3], 0  ;;  %s4421_s0 = inlined_call_operand.vmem [shape: bf16[2,18,18,4], index: 0, kind: input, shape index: {}]   ;;  %s4422_s1 = inlined_call_operand.vmem [shape: bf16[9,4,128], index: 1, kind: input, shape index: {}]   ;;  %s4423_s2 = inlined_call_operand.vmem [shape: f32[1,128], index: 2, kind: input, shape index: {}]   ;;  %s4424_s3 = inlined_call_operand.vmem [shape: f32[128,8], index: 3, kind: input, shape index: {}]   ;;  %s4425_s4 = inlined_call_operand.vmem [shape: f32[1,8], index: 4, kind: input, shape index: {}]   ;;  %s4426_s5 = inlined_call_operand.hbm [shape: f32[2,1,128], index: 5, kind: output, shape index: {0}]   ;;  %s4427_s6 = inlined_call_operand.hbm [shape: f32[2,1,8], index: 6, kind: output, shape index: {1}]  }
   0x1   :  { %14 = vsyncpa [#allocation3 + $0x1], 0 }
   0x2   :  { %15 = vsyncpa [#allocation5], 0 }
   0x3   :  { %17 = vsyncpa [#allocation5 + $0x1], 0  ;;  %s3041_s21 = smov 0   ;;  %s3043_s22 = smov 0  }
   0x4   :  { %s3045_s23 = smov 0   ;;  %s3047_s24 = smov 0  }
   0x5 LB: > { %s3062_s25 = sadd.s32 4294967295, %s3004_s24   ;;  %s2586_s26 = sadd.s32 4294967294, %s3004_s24   ;;  %s3004_s24 = sphi %s3047_s24, %s4592_s24   ;;  %s3000_s23 = sphi %s3045_s23, %s4591_s23   ;;  %s2996_s22 = sphi %s3043_s22, %s4590_s22   ;;  %s2992_s21 = sphi %s3041_s21, %s4589_s21  }
   0x6   : > { %s3066_s27 = sadd.s32 1, %s3004_s24   ;;  %s140_s28 = sadd.s32 1, %s3000_s23 }
   0x7   : > { %s137_s29 = ssub.s32 %s3004_s24, %s3066_s27  ;;  %p150_p0 = scmp.ne.s32.totalorder %s3000_s23, %s2996_s22 }
   0x8   : > { %p138_p1 = scmp.eq.s32.totalorder %s137_s29, 0  ;;  %p151_p2 = scmp.eq.s32.totalorder %s3062_s25, 1 }
   0x9   : > { %p156_p3 = scmp.ne.s32.totalorder %s2996_s22, %s2992_s21  ;;  %p157_p4 = scmp.eq.s32.totalorder %s2586_s26, 1 }
   0xa   : > { %s3077_s30 = scalar_select %p138_p1, %s3000_s23, %s140_s28  }
   0xb   : > { %p3079_p5 = por %p151_p2, %p150_p0  ;;  %p3083_p6 = por %p157_p4, %p156_p3 }
   0xc   : > { %p2589_p7 = scmp.ge.s32.totalorder %s3004_s24, 1  ;;  %p221_p8 = scmp.lt.s32.totalorder %s3004_s24, 3 }
   0xe   : > { %p222_p9 = pnand %p2589_p7, %p221_p8 }
  0x10   : > { %225 = sbr.rel (%p222_p9) target bundleno = 921 (0x399), region = 40 }
  0x15   : > { %v2591_v0 = vld [vmem:[%s4422_s1 + $0x2] sm:$0x3]  ;;  %vm801_vm0 = vcmask 1041408   ;;  %p254_p10 = scmp.lt.s32.totalorder %s3062_s25, 1  ;;  %v2704_v2 = vld [vmem:[%s4422_s1 + $0x4] sm:$0x3]  ;;  %s2486_s10 = scalar_lea.hbm %s4426_s5, %s3062_s25 }
  0x16   : > { %v803_v1 = vsel %vm801_vm0, %v2591_v0, 0  ;;  %v1344_v3 = vsel %vm801_vm0, %v2704_v2, 0  ;;  %v2721_v4 = vld [vmem:[%s4422_s1 + $0x6] sm:$0x3]  ;;  %v2742_v5 = vld [vmem:[%s4422_s1 + $0x8] sm:$0x3] }
  0x17   : > { %2853 = vmatpush.bf16.msra.mxu1 %v803_v1  ;;  %2854 = vmatpush.bf16.msra.mxu2 %v803_v1  ;;  %s255_s13 = scalar_select %p254_p10, %s3062_s25, 1  ;;  %v314_v6 = vld [vmem:[%s4422_s1] sm:$0x3]  ;;  %v1478_v7 = vsel %vm801_vm0, %v2721_v4, 0  ;;  %v1634_v8 = vsel %vm801_vm0, %v2742_v5, 0  ;;  %vm752_vm3 = vcmask 31744  }
  0x18   : > { %2855 = vmatpush.bf16.msra.mxu3 %v803_v1  ;;  %812 = vmatpush.bf16.msra.mxu0 %v803_v1  ;;  %v1023_v9 = vsel %vm801_vm0, %v314_v6, 0  ;;  %vm315_vm1 = vsmask.f32 3328  ;;  %vm316_vm2 = vsmask.f32 7440  ;;  %vm1130_vm5 = vcmask 1042432  }
  0x19   : > { %s2856_s20 = smul.u32 216, %s255_s13  ;;  %vm3148_vm4 = vmor %vm315_vm1, %vm316_vm2  ;;  %vm1131_vm6 = vcmask 1046532   ;;  %s4367_s26 = sand.u32 1, %s2996_s22  }
  0x1a   : > { %vm3458_vm7 = vmor %vm1130_vm5, %vm1131_vm6  ;;  %s247_s11 = scalar_lea.vmem [#allocation2], %s4367_s26  ;;  %s2490_s13 = sshll.u32 %s2486_s10, 4  ;;  %s2491_s13 = int_to_ptr.hbm [resolvable:$true] %s2490_s13 }
  0x1b   : > { %1353 = vmatpush.bf16.msrb.mxu2 %v1344_v3  ;;  %s3114_s29 = scalar_lea.vmem %s4421_s0, %s2856_s20  ;;  %1032 = vmatpush.bf16.msrb.mxu1 %v1023_v9  ;;  %s2488_s12 = sshll.u32 %s247_s11, 4  ;;  %s2489_s12 = int_to_ptr.vmem [resolvable:$true] %s2488_s12 }
  0x1c   : > { %1487 = vmatpush.bf16.msrb.mxu3 %v1478_v7  ;;  %1643 = vmatpush.bf16.msrb.mxu0 %v1634_v8  ;;  %v3117_v10 = vld [vmem:[%s3114_s29 + $0x3c] sm:$0xf]  ;;  %v3120_v11 = vld [vmem:[%s3114_s29 + $0x40] sm:$0xf]  ;;  %v3123_v12 = vld [vmem:[%s3114_s29 + $0x44] sm:$0x1] }
  0x1d   : > { %v439_v13 = vshrl.u32 %v3117_v10, 16  ;;  %v442_v14 = vshll.u32 %v3117_v10, 16  ;;  %v448_v15 = vshll.u32 %v3120_v11, 16  ;;  %v452_v16 = vshrl.u32 %v3120_v11, 16  ;;  %v3130_v17 = vld [vmem:[%s3114_s29 + $0x48] sm:$0xf] }
  0x1e   : > { %v458_v18 = vshll.u32 %v3123_v12, 16  ;;  %v3134_v19 = vld [vmem:[%s3114_s29 + $0x4c] sm:$0xf]  ;;  %v3137_v20 = vld [vmem:[%s3114_s29 + $0x50] sm:$0x1]  ;;  %v463_v21 = vshrl.u32 %v3130_v17, 16 }
  0x1f   : > { %v441_v22 = vrot.slane %v439_v13, 4  ;;  %v444_v23 = vrot.slane %v442_v14, 5  ;;  %v450_v24 = vrot.slane %v448_v15, 5  ;;  %v454_v25 = vrot.slane %v452_v16, 4  ;;  %v293_v26 = vld [vmem:[%s3114_s29 + $0x84] sm:$0xf] }
  0x20   : > { %v460_v27 = vrot.slane %v458_v18, 5  ;;  %v465_v28 = vrot.slane %v463_v21, 4  ;;  %v466_v29 = vshll.u32 %v3130_v17, 16  ;;  %v472_v30 = vshll.u32 %v3134_v19, 16  ;;  %v294_v35 = vld [vmem:[%s3114_s29 + $0x88] sm:$0xf] }
  0x21   : > { %v445_v31 = vor.u32 %v444_v23, %v441_v22  ;;  %v455_v32 = vor.u32 %v454_v25, %v450_v24  ;;  %v476_v33 = vshrl.u32 %v3134_v19, 16  ;;  %v482_v34 = vshll.u32 %v3137_v20, 16  ;;  %v295_v46 = vld [vmem:[%s3114_s29 + $0x8c] sm:$0x1]  ;;  %v3158_v62 = vld [vmem:[%s3114_s29] sm:$0xf] }
  0x22   : > { %v468_v37 = vrot.slane %v466_v29, 5  ;;  %v474_v38 = vrot.slane %v472_v30, 5  ;;  %v583_v39 = vshrl.u32 %v293_v26, 16  ;;  %v586_v40 = vshll.u32 %v293_v26, 16  ;;  %v3165_v2 = vld [vmem:[%s3114_s29 + $0x4] sm:$0xf] }
  0x23   : > { %v446_v41 = vrot.slane %v445_v31, 4  ;;  %v456_v42 = vrot.slane %v455_v32, 4  ;;  %v478_v43 = vrot.slane %v476_v33, 4  ;;  %v484_v44 = vrot.slane %v482_v34, 5  ;;  %v3170_v7 = vld [vmem:[%s3114_s29 + $0x8] sm:$0x1] }
  0x24   : > { %v469_v45 = vor.u32 %v468_v37, %v465_v28  ;;  %v585_v47 = vrot.slane %v583_v39, 4  ;;  %v588_v48 = vrot.slane %v586_v40, 5  ;;  %v592_v49 = vshll.u32 %v294_v35, 16  ;;  %v3181_v22 = vld [vmem:[%s3114_s29 + $0x54] sm:$0xf]  ;;  %s2474_s14 = scalar_lea.sflag [#allocation3], %s4367_s26 }
  0x25   : > { %v451_v50 = vsel %vm3148_vm4, %v446_v41, %v450_v24  ;;  %v461_v51 = vsel %vm3148_vm4, %v456_v42, %v460_v27  ;;  %v479_v52 = vor.u32 %v478_v43, %v474_v38  ;;  %v596_v53 = vshrl.u32 %v294_v35, 16  ;;  %v3187_v27 = vld [vmem:[%s3114_s29 + $0x58] sm:$0xf]  ;;  %v3192_v31 = vld [vmem:[%s3114_s29 + $0x5c] sm:$0x1]  ;;  %s2924_s15 = sshra.s32 %s2491_s13, 4  ;;  %s2925_s15 = int_to_ptr.hbm [resolvable:$true] %s2924_s15 }
  0x26   : > { %v714_v54 = vunpack.c.l.b16 %v451_v50  ;;  %v715_v55 = vunpack.c.l.b16 %v461_v51  ;;  %v470_v56 = vrot.slane %v469_v45, 4  ;;  %v589_v57 = vor.u32 %v588_v48, %v585_v47  ;;  %v296_v41 = vld [vmem:[%s3114_s29 + $0x90] sm:$0xf]  ;;  %v297_v50 = vld [vmem:[%s3114_s29 + $0x94] sm:$0xf]  ;;  %s2926_s16 = scalar_lea.hbm %s2925_s15, 1  ;;  %p2931_p0 = scmp.lt.s32.totalorder %s2925_s15, %s4426_s5 }
  0x27   : > { %v480_v58 = vrot.slane %v479_v52, 4  ;;  %v594_v59 = vrot.slane %v592_v49, 5  ;;  %v598_v60 = vrot.slane %v596_v53, 4  ;;  %v602_v61 = vshll.u32 %v295_v46, 16  ;;  %v298_v53 = vld [vmem:[%s3114_s29 + $0x98] sm:$0x1]  ;;  %p2927_p11 = scmp.ne.s32.totalorder %s2925_s15, %s2926_s16 }
  0x28   : > { %v3160_v63 = vpack.c.b16 %v715_v55, %v714_v54  ;;  %v475_v0 = vsel %vm3148_vm4, %v470_v56, %v474_v38  ;;  %v590_v1 = vrot.slane %v589_v57, 4  ;;  %v319_v13 = vshrl.u32 %v3158_v62, 16  ;;  %s2930_s19 = scalar_lea.hbm %s4426_s5, 2 }
  0x29   : > { %v485_v3 = vsel %vm3148_vm4, %v480_v58, %v484_v44  ;;  %v716_v4 = vunpack.c.l.b16 %v475_v0  ;;  %v599_v5 = vor.u32 %v598_v60, %v594_v59  ;;  %v604_v6 = vrot.slane %v602_v61, 5  ;;  %p2928_p12 = pnand %p2927_p11, %p3079_p5  ;;  %p2932_p1 = scmp.lt.s32.totalorder %s2930_s19, %s2926_s16 }
  0x2a   : > { %2597 = vmatmul.msk.bf16.vlgmr.msra.gmra.mxu1 %vm752_vm3, %v3160_v63  ;;  %v717_v8 = vunpack.c.l.b16 %v485_v3  ;;  %v595_v9 = vsel %vm3148_vm4, %v590_v1, %v594_v59  ;;  %v322_v14 = vshll.u32 %v3158_v62, 16  ;;  %v328_v18 = vshll.u32 %v3165_v2, 16 }
  0x2b   : > { %v600_v15 = vrot.slane %v599_v5, 4  ;;  %v726_v16 = vunpack.c.l.b16 %v595_v9  ;;  %v332_v21 = vshrl.u32 %v3165_v2, 16  ;;  %v321_v24 = vrot.slane %v319_v13, 4  ;;  %p2929_p13 = pneg %p2928_p12  ;;  %p2933_p2 = por %p2932_p1, %p2931_p0 }
  0x2c   : > { %v3183_v23 = vpack.c.b16 %v717_v8, %v716_v4  ;;  %v324_v25 = vrot.slane %v322_v14, 5  ;;  %v338_v26 = vshll.u32 %v3170_v7, 16  ;;  %v330_v29 = vrot.slane %v328_v18, 5  ;;  %v2835_v14 = vld [vmem:[%s3114_s29] sm:$0xff] }
  0x2d   : > { %v605_v28 = vsel %vm3148_vm4, %v600_v15, %v604_v6  ;;  %v334_v30 = vrot.slane %v332_v21, 4  ;;  %v487_v35 = vshrl.u32 %v3181_v22, 16  ;;  %v490_v38 = vshll.u32 %v3181_v22, 16  ;;  %v3213_v6 = vld [vmem:[%s3114_s29 + $0xc] sm:$0xf]  ;;  %p2934_p3 = pnand %p2933_p2, %p2929_p13 }
  0x2e   : > { %4476 = vst [vmem:[#allocation8_spill] sm:$0xff] %v3183_v23  ;;  %2598 = vmatmul.msk.bf16.vlgmr.msra.gmra.mxu2 %vm752_vm3, %v3183_v23  ;;  %v727_v32 = vunpack.c.l.b16 %v605_v28  ;;  %v325_v33 = vor.u32 %v324_v25, %v321_v24  ;;  %v340_v34 = vrot.slane %v338_v26, 5  ;;  %v496_v39 = vshll.u32 %v3187_v27, 16  ;;  %v3217_v15 = vld [vmem:[%s3114_s29 + $0x10] sm:$0xf] }
  0x2f   : > { %v335_v37 = vor.u32 %v334_v30, %v330_v29  ;;  %v500_v40 = vshrl.u32 %v3187_v27, 16  ;;  %v489_v44 = vrot.slane %v487_v35, 4  ;;  %v506_v45 = vshll.u32 %v3192_v31, 16  ;;  %v3224_v25 = vld [vmem:[%s3114_s29 + $0x14] sm:$0x1] }
  0x30   : > { %v3201_v42 = vpack.c.b16 %v727_v32, %v726_v16  ;;  %v326_v43 = vrot.slane %v325_v33, 4  ;;  %v492_v47 = vrot.slane %v490_v38, 5  ;;  %v498_v48 = vrot.slane %v496_v39, 5 }
  0x31   : > { %v336_v46 = vrot.slane %v335_v37, 4  ;;  %v502_v49 = vrot.slane %v500_v40, 4  ;;  %v508_v52 = vrot.slane %v506_v45, 5  ;;  %v607_v54 = vshrl.u32 %v296_v41, 16  ;;  %v3232_v37 = vld [vmem:[%s3114_s29 + $0x60] sm:$0xf] }
  0x32   : > { %4477 = vst [vmem:[#allocation9_spill] sm:$0xff] %v3201_v42  ;;  %2603 = vmatmul.msk.bf16.vlgmr.msra.gmra.mxu3 %vm752_vm3, %v3201_v42  ;;  %v331_v51 = vsel %vm3148_vm4, %v326_v43, %v330_v29  ;;  %v493_v57 = vor.u32 %v492_v47, %v489_v44  ;;  %v610_v61 = vshll.u32 %v296_v41, 16  ;;  %v616_v0 = vshll.u32 %v297_v50, 16  ;;  %v3239_v47 = vld [vmem:[%s3114_s29 + $0x64] sm:$0xf] }
  0x33   : > { %v341_v55 = vsel %vm3148_vm4, %v336_v46, %v340_v34  ;;  %v704_v56 = vunpack.c.l.b16 %v331_v51  ;;  %v503_v58 = vor.u32 %v502_v49, %v498_v48  ;;  %v609_v60 = vrot.slane %v607_v54, 4 }
  0x34   : > { %v705_v59 = vunpack.c.l.b16 %v341_v55  ;;  %v494_v1 = vrot.slane %v493_v57, 4  ;;  %v620_v4 = vshrl.u32 %v297_v50, 16  ;;  %v626_v5 = vshll.u32 %v298_v53, 16  ;;  %v3244_v50 = vld [vmem:[%s3114_s29 + $0x68] sm:$0x1] }
  0x35   : > { %v504_v3 = vrot.slane %v503_v58, 4  ;;  %v612_v9 = vrot.slane %v610_v61, 5  ;;  %v618_v13 = vrot.slane %v616_v0, 5  ;;  %v343_v30 = vshrl.u32 %v3213_v6, 16 }
  0x36   : > { %v736_v8 = vpack.c.b16 %v705_v59, %v704_v56  ;;  %v499_v16 = vsel %vm3148_vm4, %v494_v1, %v498_v48  ;;  %v622_v21 = vrot.slane %v620_v4, 4  ;;  %v628_v24 = vrot.slane %v626_v5, 5  ;;  %v299_v4 = vld [vmem:[%s3114_s29 + $0x9c] sm:$0xf] }
  0x37   : > { %v509_v18 = vsel %vm3148_vm4, %v504_v3, %v508_v52  ;;  %v718_v26 = vunpack.c.l.b16 %v499_v16  ;;  %v613_v29 = vor.u32 %v612_v9, %v609_v60  ;;  %v346_v33 = vshll.u32 %v3213_v6, 16 }
  0x38   : > { %2592 = vmatmul.msk.bf16.vlgmr.msra.gmra.mxu0 %vm752_vm3, %v736_v8  ;;  %v719_v28 = vunpack.c.l.b16 %v509_v18  ;;  %v623_v32 = vor.u32 %v622_v21, %v618_v13  ;;  %v352_v34 = vshll.u32 %v3217_v15, 16  ;;  %v356_v35 = vshrl.u32 %v3217_v15, 16 }
  0x39   : > { %v614_v39 = vrot.slane %v613_v29, 4  ;;  %v345_v40 = vrot.slane %v343_v30, 4  ;;  %v362_v41 = vshll.u32 %v3224_v25, 16  ;;  %v348_v44 = vrot.slane %v346_v33, 5 }
  0x3a   : > { %v3234_v38 = vpack.c.b16 %v719_v28, %v718_v26  ;;  %2672 = vmatmul.msk.bf16.vlgmr.msrb.gmra.mxu1 %vm752_vm3, %v2835_v14  ;;  %v624_v43 = vrot.slane %v623_v32, 4  ;;  %v354_v45 = vrot.slane %v352_v34, 5  ;;  %v358_v46 = vrot.slane %v356_v35, 4 }
  0x3b   : > { %v619_v48 = vsel %vm3148_vm4, %v614_v39, %v618_v13  ;;  %v364_v49 = vrot.slane %v362_v41, 5  ;;  %v511_v51 = vshrl.u32 %v3232_v37, 16  ;;  %v514_v52 = vshll.u32 %v3232_v37, 16  ;;  %v3259_v13 = vld [vmem:[%s3114_s29 + $0xa0] sm:$0xf] }
  0x3c   : > { %4478 = vst [vmem:[#allocation10_spill] sm:$0xff] %v3234_v38  ;;  %v629_v53 = vsel %vm3148_vm4, %v624_v43, %v628_v24  ;;  %v728_v54 = vunpack.c.l.b16 %v619_v48  ;;  %v349_v55 = vor.u32 %v348_v44, %v345_v40  ;;  %v359_v56 = vor.u32 %v358_v46, %v354_v45  ;;  %v3266_v24 = vld [vmem:[%s3114_s29 + $0xa4] sm:$0x1]  ;;  %v3273_v39 = vld [vmem:[%s3114_s29 + $0x18] sm:$0xf] }
  0x3d   : > { %v729_v57 = vunpack.c.l.b16 %v629_v53  ;;  %v513_v58 = vrot.slane %v511_v51, 4  ;;  %v516_v59 = vrot.slane %v514_v52, 5  ;;  %v520_v60 = vshll.u32 %v3239_v47, 16  ;;  %4480 = vst [vmem:[#allocation12_spill] sm:$0xff] %v3259_v13 }
  0x3e   : > { %2599 = vmatmul.msk.bf16.gmra.mxu2 %vm752_vm3, %v3234_v38  ;;  %v350_v61 = vrot.slane %v349_v55, 4  ;;  %v360_v0 = vrot.slane %v359_v56, 4  ;;  %v524_v1 = vshrl.u32 %v3239_v47, 16  ;;  %v530_v3 = vshll.u32 %v3244_v50, 16  ;;  %4481 = vst [vmem:[#allocation13_spill] sm:$0xff] %v3266_v24 }
  0x3f   : > { %v3256_v5 = vpack.c.b16 %v729_v57, %v728_v54  ;;  %v517_v8 = vor.u32 %v516_v59, %v513_v58  ;;  %v522_v9 = vrot.slane %v520_v60, 5  ;;  %v631_v30 = vshrl.u32 %v299_v4, 16  ;;  %v3284_v54 = vld [vmem:[%s3114_s29 + $0xc] sm:$0xff]  ;;  %v3287_v55 = vld [vmem:[%s3114_s29 + $0x20] sm:$0x1] }
  0x40   : > { %v355_v14 = vsel %vm3148_vm4, %v350_v61, %v354_v45  ;;  %v365_v16 = vsel %vm3148_vm4, %v360_v0, %v364_v49  ;;  %v526_v18 = vrot.slane %v524_v1, 4  ;;  %v532_v21 = vrot.slane %v530_v3, 5  ;;  %v3281_v45 = vld [vmem:[%s3114_s29 + $0x1c] sm:$0xf]  ;;  %v3295_v61 = vld [vmem:[%s3114_s29 + $0x6c] sm:$0xf] }
  0x41   : > { %4479 = vst [vmem:[#allocation11_spill] sm:$0xff] %v3256_v5  ;;  %v706_v26 = vunpack.c.l.b16 %v355_v14  ;;  %v707_v28 = vunpack.c.l.b16 %v365_v16  ;;  %v518_v29 = vrot.slane %v517_v8, 4  ;;  %v634_v33 = vshll.u32 %v299_v4, 16 }
  0x42   : > { %2604 = vmatmul.msk.bf16.gmra.mxu3 %vm752_vm3, %v3256_v5  ;;  %v527_v32 = vor.u32 %v526_v18, %v522_v9  ;;  %v640_v34 = vshll.u32 %v3259_v13, 16  ;;  %v644_v35 = vshrl.u32 %v3259_v13, 16  ;;  %v633_v43 = vrot.slane %v631_v30, 4 }
  0x43   : > { %v3275_v40 = vpack.c.b16 %v707_v28, %v706_v26  ;;  %v523_v41 = vsel %vm3148_vm4, %v518_v29, %v522_v9  ;;  %v650_v44 = vshll.u32 %v3266_v24, 16  ;;  %v636_v48 = vrot.slane %v634_v33, 5  ;;  %v3306_v28 = vld [vmem:[%s3114_s29 + $0x70] sm:$0xf] }
  0x44   : > { %v528_v46 = vrot.slane %v527_v32, 4  ;;  %v642_v49 = vrot.slane %v640_v34, 5  ;;  %v720_v51 = vunpack.c.l.b16 %v523_v41  ;;  %v646_v52 = vrot.slane %v644_v35, 4  ;;  %v3312_v34 = vld [vmem:[%s3114_s29 + $0x74] sm:$0x1] }
  0x45   : > { %v652_v53 = vrot.slane %v650_v44, 5  ;;  %v367_v56 = vshrl.u32 %v3273_v39, 16  ;;  %v637_v58 = vor.u32 %v636_v48, %v633_v43  ;;  %v370_v59 = vshll.u32 %v3273_v39, 16 }
  0x46   : > { %v533_v57 = vsel %vm3148_vm4, %v528_v46, %v532_v21  ;;  %v376_v60 = vshll.u32 %v3281_v45, 16  ;;  %v647_v1 = vor.u32 %v646_v52, %v642_v49  ;;  %v380_v4 = vshrl.u32 %v3281_v45, 16 }
  0x47   : > { %v721_v0 = vunpack.c.l.b16 %v533_v57  ;;  %v369_v3 = vrot.slane %v367_v56, 4  ;;  %v638_v8 = vrot.slane %v637_v58, 4  ;;  %v372_v9 = vrot.slane %v370_v59, 5  ;;  %v3323_v59 = vld [vmem:[%s3114_s29 + $0xa8] sm:$0xf] }
  0x48   : > { %2593 = vmatmul.msk.bf16.gmra.mxu0 %vm752_vm3, %v3275_v40  ;;  %v378_v14 = vrot.slane %v376_v60, 5  ;;  %v386_v16 = vshll.u32 %v3287_v55, 16  ;;  %v648_v21 = vrot.slane %v647_v1, 4  ;;  %v382_v26 = vrot.slane %v380_v4, 4  ;;  %4483 = vst [vmem:[#allocation15_spill] sm:$0xff] %v3323_v59 }
  0x49   : > { %v3301_v18 = vpack.c.b16 %v721_v0, %v720_v51  ;;  %v535_v29 = vshrl.u32 %v3295_v61, 16  ;;  %v643_v30 = vsel %vm3148_vm4, %v638_v8, %v642_v49  ;;  %v373_v32 = vor.u32 %v372_v9, %v369_v3  ;;  %v3330_v3 = vld [vmem:[%s3114_s29 + $0xac] sm:$0xf]  ;;  %v3333_v4 = vld [vmem:[%s3114_s29 + $0xb0] sm:$0x1] }
  0x4a   : > { %2673 = vmatmul.msk.bf16.gmra.mxu1 %vm752_vm3, %v3284_v54  ;;  %v388_v33 = vrot.slane %v386_v16, 5  ;;  %v538_v35 = vshll.u32 %v3295_v61, 16  ;;  %v653_v41 = vsel %vm3148_vm4, %v648_v21, %v652_v53  ;;  %v730_v43 = vunpack.c.l.b16 %v643_v30  ;;  %4485 = vst [vmem:[#allocation17_spill] sm:$0xff] %v3330_v3 }
  0x4b   : > { %4482 = vst [vmem:[#allocation14_spill] sm:$0xff] %v3301_v18  ;;  %v383_v44 = vor.u32 %v382_v26, %v378_v14  ;;  %v537_v46 = vrot.slane %v535_v29, 4  ;;  %v731_v48 = vunpack.c.l.b16 %v653_v41  ;;  %v374_v51 = vrot.slane %v373_v32, 4 }
  0x4c   : > { %v540_v52 = vrot.slane %v538_v35, 5  ;;  %v544_v49 = vshll.u32 %v3306_v28, 16  ;;  %v548_v57 = vshrl.u32 %v3306_v28, 16  ;;  %v554_v58 = vshll.u32 %v3312_v34, 16  ;;  %4486 = vst [vmem:[#allocation18_spill] sm:$0xff] %v3333_v4 }
  0x4d   : > { %v384_v56 = vrot.slane %v383_v44, 4  ;;  %v3325_v53 = vpack.c.b16 %v731_v48, %v730_v43  ;;  %v379_v60 = vsel %vm3148_vm4, %v374_v51, %v378_v14  ;;  %v655_v30 = vshrl.u32 %v3323_v59, 16  ;;  %v3345_v43 = vld [vmem:[%s3114_s29 + $0x24] sm:$0xf]  ;;  %v3350_v51 = vld [vmem:[%s3114_s29 + $0x28] sm:$0xf] }
  0x4e   : > { %2600 = vmatmul.msk.bf16.gmra.mxu2 %vm752_vm3, %v3301_v18  ;;  %v541_v0 = vor.u32 %v540_v52, %v537_v46  ;;  %v546_v1 = vrot.slane %v544_v49, 5  ;;  %v708_v9 = vunpack.c.l.b16 %v379_v60  ;;  %v550_v16 = vrot.slane %v548_v57, 4 }
  0x4f   : > { %4484 = vst [vmem:[#allocation16_spill] sm:$0xff] %v3325_v53  ;;  %v389_v8 = vsel %vm3148_vm4, %v384_v56, %v388_v33  ;;  %v556_v21 = vrot.slane %v554_v58, 5  ;;  %v658_v14 = vshll.u32 %v3323_v59, 16  ;;  %v664_v35 = vshll.u32 %v3330_v3, 16 }
  0x50   : > { %v709_v26 = vunpack.c.l.b16 %v389_v8  ;;  %v542_v29 = vrot.slane %v541_v0, 4  ;;  %v551_v32 = vor.u32 %v550_v16, %v546_v1  ;;  %v668_v41 = vshrl.u32 %v3330_v3, 16  ;;  %v3355_v8 = vld [vmem:[%s3114_s29 + $0x2c] sm:$0x1] }
  0x51   : > { %v674_v33 = vshll.u32 %v3333_v4, 16  ;;  %v657_v46 = vrot.slane %v655_v30, 4  ;;  %v660_v48 = vrot.slane %v658_v14, 5  ;;  %v666_v56 = vrot.slane %v664_v35, 5  ;;  %v3361_v30 = vld [vmem:[%s3114_s29 + $0x18] sm:$0xff] }
  0x52   : > { %2605 = vmatmul.msk.bf16.gmra.mxu3 %vm752_vm3, %v3325_v53  ;;  %v547_v44 = vsel %vm3148_vm4, %v542_v29, %v546_v1  ;;  %v3352_v52 = vpack.c.b16 %v709_v26, %v708_v9  ;;  %v552_v49 = vrot.slane %v551_v32, 4  ;;  %v670_v57 = vrot.slane %v668_v41, 4  ;;  %v3366_v14 = vld [vmem:[%s3114_s29 + $0x78] sm:$0xf]  ;;  %v3377_v4 = vld [vmem:[%s3114_s29 + $0x7c] sm:$0xf] }
  0x53   : > { %v722_v58 = vunpack.c.l.b16 %v547_v44  ;;  %v661_v60 = vor.u32 %v660_v48, %v657_v46  ;;  %v676_v0 = vrot.slane %v674_v33, 5  ;;  %v391_v16 = vshrl.u32 %v3345_v43, 16  ;;  %4487 = vst [vmem:[#allocation19_spill] sm:$0xff] %v3366_v14 }
  0x54   : > { %v557_v1 = vsel %vm3148_vm4, %v552_v49, %v556_v21  ;;  %v671_v29 = vor.u32 %v670_v57, %v666_v56  ;;  %v394_v9 = vshll.u32 %v3345_v43, 16  ;;  %v400_v26 = vshll.u32 %v3350_v51, 16 }
  0x55   : > { %v723_v32 = vunpack.c.l.b16 %v557_v1  ;;  %v662_v35 = vrot.slane %v661_v60, 4  ;;  %v393_v41 = vrot.slane %v391_v16, 4  ;;  %v404_v33 = vshrl.u32 %v3350_v51, 16  ;;  %v3380_v60 = vld [vmem:[%s3114_s29 + $0x80] sm:$0x1] }
  0x56   : > { %v672_v21 = vrot.slane %v671_v29, 4  ;;  %v396_v44 = vrot.slane %v394_v9, 5  ;;  %v402_v46 = vrot.slane %v400_v26, 5  ;;  %v410_v48 = vshll.u32 %v3355_v8, 16  ;;  %4489 = vst [vmem:[#allocation21_spill] sm:$0xff] %v3380_v60 }
  0x57   : > { %v3372_v49 = vpack.c.b16 %v723_v32, %v722_v58  ;;  %v667_v57 = vsel %vm3148_vm4, %v662_v35, %v666_v56  ;;  %v406_v59 = vrot.slane %v404_v33, 4  ;;  %v559_v16 = vshrl.u32 %v3366_v14, 16 }
  0x58   : > { %2594 = vmatmul.msk.bf16.gmra.mxu0 %vm752_vm3, %v3352_v52  ;;  %v677_v1 = vsel %vm3148_vm4, %v672_v21, %v676_v0  ;;  %v732_v29 = vunpack.c.l.b16 %v667_v57  ;;  %v397_v58 = vor.u32 %v396_v44, %v393_v41  ;;  %v412_v9 = vrot.slane %v410_v48, 5  ;;  %v3392_v21 = vld [vmem:[%s3114_s29 + $0xb4] sm:$0xf]  ;;  %v3397_v44 = vld [vmem:[%s3114_s29 + $0xb8] sm:$0xf] }
  0x59   : > { %4488 = vst [vmem:[#allocation20_spill] sm:$0xff] %v3372_v49  ;;  %v733_v26 = vunpack.c.l.b16 %v677_v1  ;;  %v407_v56 = vor.u32 %v406_v59, %v402_v46  ;;  %v561_v32 = vrot.slane %v559_v16, 4  ;;  %v562_v35 = vshll.u32 %v3366_v14, 16  ;;  %v3414_v14 = vld [vmem:[%s3114_s29 + $0x30] sm:$0xf] }
  0x5a   : > { %2674 = vmatmul.msk.bf16.gmra.mxu1 %vm752_vm3, %v3361_v30  ;;  %v398_v33 = vrot.slane %v397_v58, 4  ;;  %v568_v3 = vshll.u32 %v3377_v4, 16  ;;  %v572_v53 = vshrl.u32 %v3377_v4, 16  ;;  %v578_v0 = vshll.u32 %v3380_v60, 16  ;;  %4490 = vst [vmem:[#allocation22_spill] sm:$0xff] %v3392_v21  ;;  %v3435_v60 = vld [vmem:[%s3114_s29 + $0x24] sm:$0xff] }
  0x5b   : > { %v3394_v57 = vpack.c.b16 %v733_v26, %v732_v29  ;;  %v408_v24 = vrot.slane %v407_v56, 4  ;;  %v564_v41 = vrot.slane %v562_v35, 5  ;;  %4492 = vst [vmem:[#allocation24_spill] sm:$0xff] %v3397_v44  ;;  %v3404_v58 = vld [vmem:[%s3114_s29 + $0xbc] sm:$0x1]  ;;  %v679_v35 = vshrl.u32 %v3392_v21, 16 }
  0x5c   : > { %v403_v59 = vsel %vm3148_vm4, %v398_v33, %v402_v46  ;;  %v570_v48 = vrot.slane %v568_v3, 5  ;;  %v574_v16 = vrot.slane %v572_v53, 4  ;;  %v580_v1 = vrot.slane %v578_v0, 5  ;;  %4493 = vst [vmem:[#allocation25_spill] sm:$0xff] %v3404_v58 }
  0x5d   : > { %4491 = vst [vmem:[#allocation23_spill] sm:$0xff] %v3394_v57  ;;  %v413_v29 = vsel %vm3148_vm4, %v408_v24, %v412_v9  ;;  %v710_v26 = vunpack.c.l.b16 %v403_v59  ;;  %v565_v56 = vor.u32 %v564_v41, %v561_v32  ;;  %v682_v42 = vshll.u32 %v3392_v21, 16  ;;  %v3420_v59 = vld [vmem:[%s3114_s29 + $0x34] sm:$0xf]  ;;  %v3427_v21 = vld [vmem:[%s3114_s29 + $0x38] sm:$0x1] }
  0x5e   : > { %2601 = vmatmul.msk.bf16.gmra.mxu2 %vm752_vm3, %v3372_v49  ;;  %v711_v13 = vunpack.c.l.b16 %v413_v29  ;;  %v575_v5 = vor.u32 %v574_v16, %v570_v48  ;;  %v688_v46 = vshll.u32 %v3397_v44, 16  ;;  %v681_v53 = vrot.slane %v679_v35, 4 }
  0x5f   : > { %v566_v3 = vrot.slane %v565_v56, 4  ;;  %v692_v33 = vshrl.u32 %v3397_v44, 16  ;;  %v698_v0 = vshll.u32 %v3404_v58, 16  ;;  %v684_v32 = vrot.slane %v682_v42, 5 }
  0x60   : > { %v576_v9 = vrot.slane %v575_v5, 4  ;;  %v690_v41 = vrot.slane %v688_v46, 5  ;;  %v3422_v16 = vpack.c.b16 %v711_v13, %v710_v26  ;;  %v415_v42 = vshrl.u32 %v3414_v14, 16 }
  0x61   : > { %v571_v29 = vsel %vm3148_vm4, %v566_v3, %v570_v48  ;;  %v694_v56 = vrot.slane %v692_v33, 4  ;;  %v700_v35 = vrot.slane %v698_v0, 5  ;;  %v685_v44 = vor.u32 %v684_v32, %v681_v53 }
  0x62   : > { %2606 = vmatmul.msk.bf16.gmra.mxu3 %vm752_vm3, %v3394_v57  ;;  %v581_v24 = vsel %vm3148_vm4, %v576_v9, %v580_v1  ;;  %v724_v58 = vunpack.c.l.b16 %v571_v29  ;;  %v418_v57 = vshll.u32 %v3414_v14, 16  ;;  %v424_v13 = vshll.u32 %v3420_v59, 16 }
  0x63   : > { %v725_v5 = vunpack.c.l.b16 %v581_v24  ;;  %v695_v46 = vor.u32 %v694_v56, %v690_v41  ;;  %v686_v26 = vrot.slane %v685_v44, 4  ;;  %v417_v48 = vrot.slane %v415_v42, 4  ;;  %v2777_v24 = vld [vmem:[%s4422_s1 + $0xc] sm:$0x3] }
  0x64   : > { %v428_v3 = vshrl.u32 %v3420_v59, 16  ;;  %v434_v33 = vshll.u32 %v3427_v21, 16  ;;  %v420_v53 = vrot.slane %v418_v57, 5  ;;  %v426_v9 = vrot.slane %v424_v13, 5 }
  0x65   : > { %v3439_v0 = vpack.c.b16 %v725_v5, %v724_v58  ;;  %v696_v1 = vrot.slane %v695_v46, 4  ;;  %v691_v44 = vsel %vm3148_vm4, %v686_v26, %v690_v41  ;;  %v2798_v58 = vld [vmem:[%s4422_s1 + $0xe] sm:$0x3]  ;;  %v2760_v5 = vld [vmem:[%s4422_s1 + $0xa] sm:$0x3]  ;;  %v2688_v26 = vrot.slane %v3158_v62, 9 }
  0x66   : > { %v430_v32 = vrot.slane %v428_v3, 4  ;;  %v436_v29 = vrot.slane %v434_v33, 5  ;;  %v734_v56 = vunpack.c.l.b16 %v691_v44  ;;  %v421_v42 = vor.u32 %v420_v53, %v417_v48  ;;  %v2816_v48 = vld [vmem:[%s4422_s1 + $0x10] sm:$0x3] }
  0x67   : > { %4494 = vst [vmem:[#allocation26_spill] sm:$0xff] %v3439_v0  ;;  %v701_v57 = vsel %vm3148_vm4, %v696_v1, %v700_v35  ;;  %v1135_v35 = vrot.slane %v3165_v2, 5  ;;  %v1908_v33 = vsel %vm801_vm0, %v2777_v24, 0  ;;  %v2064_v1 = vsel %vm801_vm0, %v2798_v58, 0 }
  0x68   : > { %2595 = vmatmul.msk.bf16.gmra.mxu0 %vm752_vm3, %v3422_v16  ;;  %v735_v46 = vunpack.c.l.b16 %v701_v57  ;;  %v431_v41 = vor.u32 %v430_v32, %v426_v9  ;;  %v422_v3 = vrot.slane %v421_v42, 4  ;;  %v1774_v53 = vsel %vm801_vm0, %v2760_v5, 0  ;;  %1917 = vmatpush.bf16.msra.mxu2 %v1908_v33 }
  0x69   : > { %v1136_v32 = vsel %vm3458_vm7, %v2688_v26, %v1135_v35  ;;  %v1137_v57 = vrot.slane %v1135_v35, 4  ;;  %2073 = vmatpush.bf16.msra.mxu3 %v2064_v1  ;;  %1783 = vmatpush.bf16.msra.mxu1 %v1774_v53  ;;  %v2204_v42 = vsel %vm801_vm0, %v2816_v48, 0  ;;  %v2689_v24 = vrot.slane %v3213_v6, 9 }
  0x6a   : > { %2675 = vmatmul.msk.bf16.gmra.mxu1 %vm752_vm3, %v3435_v60  ;;  %v432_v44 = vrot.slane %v431_v41, 4  ;;  %v427_v62 = vsel %vm3148_vm4, %v422_v3, %v426_v9  ;;  %v1247_v2 = vunpack.c.l.b16 %v1136_v32  ;;  %v3478_v58 = vpack.c.b16 %v735_v46, %v734_v56  ;;  %2213 = vmatpush.bf16.msra.mxu0 %v2204_v42 }
  0x6b   : > { %v4497_v41 = vrot.slane %v3170_v7, 5  ;;  %v1142_v9 = vrot.slane %v3217_v15, 5  ;;  %v1145_v6 = vrot.slane %v3224_v25, 5  ;;  %v712_v48 = vunpack.c.l.b16 %v427_v62  ;;  %v3499_v25 = vld [vmem:[%s3114_s29 + $0x30] sm:$0xff] }
  0x6c   : > { %v437_v5 = vsel %vm3148_vm4, %v432_v44, %v436_v29  ;;  %v2690_v44 = vrot.slane %v3273_v39, 9  ;;  %v1149_v32 = vrot.slane %v3281_v45, 5  ;;  %v3518_v39 = vld [vmem:[%s3114_s29 + $0x3c] sm:$0xff]  ;;  %v1156_v45 = vrot.slane %v3350_v51, 5 }
  0x6d   : > { %v1139_v26 = vsel %vm3458_vm7, %v1137_v57, %v4497_v41  ;;  %v713_v3 = vunpack.c.l.b16 %v437_v5  ;;  %v1143_v56 = vsel %vm3458_vm7, %v2689_v24, %v1142_v9  ;;  %v1144_v46 = vrot.slane %v1142_v9, 4 }
  0x6e   : > { %2602 = vmatmul.msk.bf16.gmra.mxu2 %vm752_vm3, %v3439_v0  ;;  %v1248_v35 = vunpack.c.l.b16 %v1139_v26  ;;  %v1249_v29 = vunpack.c.l.b16 %v1143_v56  ;;  %v1152_v57 = vrot.slane %v3287_v55, 5  ;;  %v1150_v62 = vsel %vm3458_vm7, %v2690_v44, %v1149_v32 }
  0x6f   : > { %v1146_v7 = vsel %vm3458_vm7, %v1144_v46, %v1145_v6  ;;  %v3494_v53 = vpack.c.b16 %v713_v3, %v712_v48  ;;  %v1251_v42 = vunpack.c.l.b16 %v1150_v62  ;;  %v2691_v55 = vrot.slane %v3345_v43, 9  ;;  %v3538_v48 = vld [vmem:[%s3114_s29 + $0x48] sm:$0xff] }
  0x70   : > { %v1279_v33 = vpack.c.b16 %v1248_v35, %v1247_v2  ;;  %v1250_v1 = vunpack.c.l.b16 %v1146_v7  ;;  %v1151_v2 = vrot.slane %v1149_v32, 4  ;;  %v1158_v26 = vrot.slane %v1156_v45, 4  ;;  %4498 = vst [vmem:[#allocation27_spill] sm:$0xff] %v3538_v48  ;;  %v3558_v7 = vld [vmem:[%s3114_s29 + $0x54] sm:$0xff] }
  0x71   : > { %v1159_v9 = vrot.slane %v3355_v8, 5  ;;  %v1163_v43 = vrot.slane %v3420_v59, 5  ;;  %v2692_v8 = vrot.slane %v3414_v14, 9  ;;  %v1166_v3 = vrot.slane %v3427_v21, 5  ;;  %4499 = vst [vmem:[#allocation28_spill] sm:$0xff] %v3558_v7 }
  0x72   : > { %2607 = vmatmul.msk.bf16.gmra.mxu3 %vm752_vm3, %v3478_v58  ;;  %v3496_v15 = vpack.c.b16 %v1250_v1, %v1249_v29  ;;  %v1153_v24 = vsel %vm3458_vm7, %v1151_v2, %v1152_v57  ;;  %v3577_v57 = vld [vmem:[%s3114_s29 + $0x60] sm:$0xff] }
  0x73   : > { %v1252_v5 = vunpack.c.l.b16 %v1153_v24  ;;  %v1160_v35 = vsel %vm3458_vm7, %v1158_v26, %v1159_v9  ;;  %v1164_v56 = vsel %vm3458_vm7, %v2692_v8, %v1163_v43  ;;  %4500 = vst [vmem:[#allocation29_spill] sm:$0xff] %v3577_v57  ;;  %v1170_v24 = vrot.slane %v3120_v11, 5 }
  0x74   : > { %v1254_v6 = vunpack.c.l.b16 %v1160_v35  ;;  %v2693_v26 = vrot.slane %v3117_v10, 9  ;;  %v3607_v10 = vld [vmem:[%s3114_s29 + $0x6c] sm:$0xff] }
  0x75   : > { %v3513_v41 = vpack.c.b16 %v1252_v5, %v1251_v42  ;;  %v1172_v9 = vrot.slane %v1170_v24, 4  ;;  %4502 = vst [vmem:[#allocation31_spill] sm:$0xff] %v3607_v10 }
  0x76   : > { %v1171_v11 = vsel %vm3458_vm7, %v2693_v26, %v1170_v24  ;;  %v1180_v26 = vrot.slane %v3137_v20, 5 }
  0x78   : > { %2596 = vmatmul.msk.bf16.gmra.mxu0 %vm752_vm3, %v3494_v53 }
  0x7a   : > { %2676 = vmatmul.msk.bf16.gmra.mxu1 %vm752_vm3, %v3499_v25 }
  0x7e   : > { %2705 = vmatmul.msk.bf16.vlgmr.msrb.gmra.mxu2 %vm752_vm3, %v1279_v33  ;;  %v1255_v33 = vunpack.c.l.b16 %v1164_v56 }
  0x82   : > { %2726 = vmatmul.msk.bf16.vlgmr.msrb.gmra.mxu3 %vm752_vm3, %v3284_v54  ;;  %v1157_v54 = vsel %vm3458_vm7, %v2691_v55, %v1156_v45 }
  0x88   : > { %2743 = vmatmul.msk.bf16.vlgmr.msrb.gmra.mxu0 %vm752_vm3, %v3275_v40  ;;  %v1253_v40 = vunpack.c.l.b16 %v1157_v54  ;;  %v1173_v54 = vrot.slane %v3123_v12, 5 }
  0x8a   : > { %2677 = vmatmul.msk.bf16.gmra.mxu1 %vm752_vm3, %v3518_v39  ;;  %v3535_v51 = vpack.c.b16 %v1254_v6, %v1253_v40  ;;  %v1174_v6 = vsel %vm3458_vm7, %v1172_v9, %v1173_v54 }
  0x8b   : > { %v1258_v12 = vunpack.c.l.b16 %v1174_v6 }
  0x8e   : > { %2706 = vmatmul.msk.bf16.gmra.mxu2 %vm752_vm3, %v3496_v15 }
  0x92   : > { %2727 = vmatmul.msk.bf16.gmra.mxu3 %vm752_vm3, %v3361_v30  ;;  %v1165_v30 = vrot.slane %v1163_v43, 4 }
  0x94   : > { %v1167_v46 = vsel %vm3458_vm7, %v1165_v30, %v1166_v3  ;;  %v1257_v30 = vunpack.c.l.b16 %v1171_v11 }
  0x95   : > { %v1256_v59 = vunpack.c.l.b16 %v1167_v46 }
  0x97   : > { %v3555_v29 = vpack.c.b16 %v1256_v59, %v1255_v33  ;;  %v3617_v33 = vpack.c.b16 %v1258_v12, %v1257_v30  ;;  %v1177_v59 = vrot.slane %v3134_v19, 5 }
  0x98   : > { %2744 = vmatmul.msk.bf16.gmra.mxu0 %vm752_vm3, %v3352_v52 }
  0x9a   : > { %2678 = vmatmul.msk.bf16.gmra.mxu1 %vm752_vm3, %v3538_v48 }
  0x9e   : > { %2707 = vmatmul.msk.bf16.gmra.mxu2 %vm752_vm3, %v3513_v41 }
  0xa2   : > { %2728 = vmatmul.msk.bf16.gmra.mxu3 %vm752_vm3, %v3435_v60 }
  0xa7   : > { %v3560_v14 = vpop.f32.mrf.mxu1 }
  0xa8   : > { %2745 = vmatmul.msk.bf16.gmra.mxu0 %vm752_vm3, %v3422_v16 }
  0xaa   : > { %2679 = vmatmul.msk.bf16.gmra.mxu1 %vm752_vm3, %v3558_v7 }
  0xae   : > { %2708 = vmatmul.msk.bf16.gmra.mxu2 %vm752_vm3, %v3535_v51 }
  0xaf   : > { %v3568_v21 = vpop.f32.mrf.mxu1 }
  0xb1   : > { %v3570_v1 = vpop.f32.mrf.mxu2 }
  0xb2   : > { %2729 = vmatmul.msk.bf16.gmra.mxu3 %vm752_vm3, %v3499_v25 }
  0xb5   : > { %v814_v44 = vpop.f32.mrf.mxu0  ;;  %v3574_v32 = vpop.f32.mrf.mxu3 }
  0xb7   : > { %v1034_v62 = vpop.f32.mrf.mxu1 }
  0xb8   : > { %2746 = vmatmul.msk.bf16.gmra.mxu0 %vm752_vm3, %v3494_v53  ;;  %v3581_v2 = vadd.f32 %v1034_v62, %v814_v44 }
  0xb9   : > { %v3583_v42 = vpop.f32.mrf.mxu2 }
  0xba   : > { %2680 = vmatmul.msk.bf16.gmra.mxu1 %vm752_vm3, %v3577_v57 }
  0xbd   : > { %v816_v5 = vpop.f32.mrf.mxu0  ;;  %v3588_v45 = vpop.f32.mrf.mxu3 }
  0xbe   : > { %2709 = vmatmul.msk.bf16.gmra.mxu2 %vm752_vm3, %v3555_v29 }
  0xbf   : > { %v1036_v55 = vpop.f32.mrf.mxu1 }
  0xc0   : > { %v3594_v35 = vadd.f32 %v1036_v55, %v816_v5  ;;  %v2694_v5 = vrot.slane %v3130_v17, 9  ;;  %v1179_v55 = vrot.slane %v1177_v59, 4  ;;  %v3639_v17 = vld [vmem:[%s3114_s29 + $0x78] sm:$0xff] }
  0xc1   : > { %v3596_v40 = vpop.f32.mrf.mxu2  ;;  %4505 = vst [vmem:[#allocation34_spill] sm:$0xff] %v3639_v17 }
  0xc2   : > { %2730 = vmatmul.msk.bf16.gmra.mxu3 %vm752_vm3, %v3518_v39  ;;  %v1178_v19 = vsel %vm3458_vm7, %v2694_v5, %v1177_v59  ;;  %v1181_v11 = vsel %vm3458_vm7, %v1179_v55, %v1180_v26  ;;  %v1187_v26 = vrot.slane %v3192_v31, 5  ;;  %v3671_v31 = vld [vmem:[%s3114_s29 + $0x84] sm:$0xff] }
  0xc3   : > { %v1259_v30 = vunpack.c.l.b16 %v1178_v19  ;;  %v1260_v20 = vunpack.c.l.b16 %v1181_v11  ;;  %v2695_v11 = vrot.slane %v3181_v22, 9  ;;  %4508 = vst [vmem:[#allocation37_spill] sm:$0xff] %v3671_v31 }
  0xc5   : > { %v819_v43 = vpop.f32.mrf.mxu0  ;;  %v3604_v8 = vpop.f32.mrf.mxu3  ;;  %v3649_v59 = vpack.c.b16 %v1260_v20, %v1259_v30 }
  0xc6   : > { %4501 = vst [vmem:[#allocation30_spill] sm:$0xff] %v3604_v8 }
  0xc7   : > { %v1039_v3 = vpop.f32.mrf.mxu1 }
  0xc8   : > { %2747 = vmatmul.msk.bf16.gmra.mxu0 %vm752_vm3, %v3160_v63  ;;  %v3611_v56 = vadd.f32 %v1039_v3, %v819_v43 }
  0xc9   : > { %v3613_v46 = vpop.f32.mrf.mxu2 }
  0xca   : > { %2681 = vmatmul.msk.bf16.gmra.mxu1 %vm752_vm3, %v3607_v10 }
  0xcd   : > { %v821_v44 = vpop.f32.mrf.mxu0  ;;  %v3620_v62 = vpop.f32.mrf.mxu3 }
  0xce   : > { %4503 = vst [vmem:[#allocation32_spill] sm:$0xff] %v3620_v62  ;;  %2710 = vmatmul.msk.bf16.gmra.mxu2 %vm752_vm3, %v3617_v33 }
  0xcf   : > { %v1041_v24 = vpop.f32.mrf.mxu1 }
  0xd0   : > { %v3626_v9 = vadd.f32 %v1041_v24, %v821_v44  ;;  %v1184_v24 = vrot.slane %v3187_v27, 5 }
  0xd1   : > { %v3628_v54 = vpop.f32.mrf.mxu2 }
  0xd2   : > { %2731 = vmatmul.msk.bf16.gmra.mxu3 %vm752_vm3, %v3538_v48  ;;  %v1185_v27 = vsel %vm3458_vm7, %v2695_v11, %v1184_v24  ;;  %v3732_v48 = vld [vmem:[%s3114_s29 + $0x9c] sm:$0xff] }
  0xd3   : > { %v1261_v22 = vunpack.c.l.b16 %v1185_v27  ;;  %v1194_v27 = vrot.slane %v3244_v50, 5  ;;  %v3703_v50 = vld [vmem:[%s3114_s29 + $0x90] sm:$0xff]  ;;  %4513 = vst [vmem:[#allocation42_spill] sm:$0xff] %v3732_v48 }
  0xd4   : > { %4511 = vst [vmem:[#allocation40_spill] sm:$0xff] %v3703_v50 }
  0xd5   : > { %v824_v6 = vpop.f32.mrf.mxu0  ;;  %v3636_v43 = vpop.f32.mrf.mxu3 }
  0xd6   : > { %4504 = vst [vmem:[#allocation33_spill] sm:$0xff] %v3636_v43 }
  0xd7   : > { %v1044_v12 = vpop.f32.mrf.mxu1 }
  0xd8   : > { %2748 = vmatmul.msk.bf16.gmra.mxu0 %vm752_vm3, %v3183_v23  ;;  %v3643_v3 = vadd.f32 %v1044_v12, %v824_v6  ;;  %v1186_v6 = vrot.slane %v1184_v24, 4 }
  0xd9   : > { %v3645_v44 = vpop.f32.mrf.mxu2 }
  0xda   : > { %2682 = vmatmul.msk.bf16.gmra.mxu1 %vm752_vm3, %v3639_v17  ;;  %v1188_v30 = vsel %vm3458_vm7, %v1186_v6, %v1187_v26  ;;  %v1191_v26 = vrot.slane %v3239_v47, 5 }
  0xdb   : > { %v1262_v62 = vunpack.c.l.b16 %v1188_v30 }
  0xdd   : > { %v826_v5 = vpop.f32.mrf.mxu0  ;;  %v3652_v55 = vpop.f32.mrf.mxu3  ;;  %v3681_v24 = vpack.c.b16 %v1262_v62, %v1261_v22 }
  0xde   : > { %4506 = vst [vmem:[#allocation35_spill] sm:$0xff] %v3652_v55  ;;  %2711 = vmatmul.msk.bf16.gmra.mxu2 %vm752_vm3, %v3649_v59 }
  0xdf   : > { %v1046_v19 = vpop.f32.mrf.mxu1 }
  0xe0   : > { %v3658_v12 = vadd.f32 %v1046_v19, %v826_v5 }
  0xe1   : > { %v3660_v43 = vpop.f32.mrf.mxu2 }
  0xe2   : > { %2732 = vmatmul.msk.bf16.gmra.mxu3 %vm752_vm3, %v3558_v7 }
  0xe5   : > { %v829_v20 = vpop.f32.mrf.mxu0  ;;  %v3668_v55 = vpop.f32.mrf.mxu3 }
  0xe6   : > { %4507 = vst [vmem:[#allocation36_spill] sm:$0xff] %v3668_v55 }
  0xe7   : > { %v1049_v5 = vpop.f32.mrf.mxu1 }
  0xe8   : > { %2749 = vmatmul.msk.bf16.gmra.mxu0 %vm752_vm3, %v3234_v38  ;;  %v3675_v19 = vadd.f32 %v1049_v5, %v829_v20  ;;  %v2696_v20 = vrot.slane %v3232_v37, 9  ;;  %v1193_v5 = vrot.slane %v1191_v26, 4 }
  0xe9   : > { %v3677_v7 = vpop.f32.mrf.mxu2 }
  0xea   : > { %2683 = vmatmul.msk.bf16.gmra.mxu1 %vm752_vm3, %v3671_v31  ;;  %v1192_v47 = vsel %vm3458_vm7, %v2696_v20, %v1191_v26  ;;  %v1195_v62 = vsel %vm3458_vm7, %v1193_v5, %v1194_v27  ;;  %v1198_v27 = vrot.slane %v3306_v28, 5 }
  0xeb   : > { %v1263_v37 = vunpack.c.l.b16 %v1192_v47  ;;  %v1264_v23 = vunpack.c.l.b16 %v1195_v62  ;;  %v1201_v47 = vrot.slane %v3312_v34, 5 }
  0xed   : > { %v831_v11 = vpop.f32.mrf.mxu0  ;;  %v3684_v6 = vpop.f32.mrf.mxu3  ;;  %v3713_v26 = vpack.c.b16 %v1264_v23, %v1263_v37 }
  0xee   : > { %4509 = vst [vmem:[#allocation38_spill] sm:$0xff] %v3684_v6  ;;  %2712 = vmatmul.msk.bf16.gmra.mxu2 %vm752_vm3, %v3681_v24 }
  0xef   : > { %v1051_v30 = vpop.f32.mrf.mxu1 }
  0xf0   : > { %v3690_v55 = vadd.f32 %v1051_v30, %v831_v11 }
  0xf1   : > { %v3692_v38 = vpop.f32.mrf.mxu2 }
  0xf2   : > { %2733 = vmatmul.msk.bf16.gmra.mxu3 %vm752_vm3, %v3577_v57 }
  0xf5   : > { %v834_v22 = vpop.f32.mrf.mxu0  ;;  %v3700_v6 = vpop.f32.mrf.mxu3 }
  0xf6   : > { %4510 = vst [vmem:[#allocation39_spill] sm:$0xff] %v3700_v6 }
  0xf7   : > { %v1054_v11 = vpop.f32.mrf.mxu1 }
  0xf8   : > { %2750 = vmatmul.msk.bf16.gmra.mxu0 %vm752_vm3, %v3301_v18  ;;  %v3707_v30 = vadd.f32 %v1054_v11, %v834_v22  ;;  %v2697_v22 = vrot.slane %v3295_v61, 9  ;;  %v1200_v11 = vrot.slane %v1198_v27, 4 }
  0xf9   : > { %v3709_v57 = vpop.f32.mrf.mxu2 }
  0xfa   : > { %2684 = vmatmul.msk.bf16.gmra.mxu1 %vm752_vm3, %v3703_v50  ;;  %v1199_v28 = vsel %vm3458_vm7, %v2697_v22, %v1198_v27  ;;  %v1202_v37 = vsel %vm3458_vm7, %v1200_v11, %v1201_v47  ;;  %v1205_v47 = vrot.slane %v3377_v4, 5 }
  0xfb   : > { %v1265_v61 = vunpack.c.l.b16 %v1199_v28  ;;  %v4514_v28 = vld [vmem:[#allocation21_spill] sm:$0xff] }
  0xfd   : > { %v836_v20 = vpop.f32.mrf.mxu0  ;;  %v3716_v5 = vpop.f32.mrf.mxu3 }
  0xfe   : > { %4512 = vst [vmem:[#allocation41_spill] sm:$0xff] %v3716_v5  ;;  %2713 = vmatmul.msk.bf16.gmra.mxu2 %vm752_vm3, %v3713_v26 }
  0xff   : > { %v1056_v62 = vpop.f32.mrf.mxu1 }
 0x100   : > { %v3722_v6 = vadd.f32 %v1056_v62, %v836_v20  ;;  %v1266_v20 = vunpack.c.l.b16 %v1202_v37  ;;  %v4515_v37 = vld [vmem:[#allocation19_spill] sm:$0xff] }
 0x101   : > { %v1355_v18 = vpop.f32.mrf.mxu2 }
 0x102   : > { %2734 = vmatmul.msk.bf16.gmra.mxu3 %vm752_vm3, %v3607_v10  ;;  %v1435_v23 = vadd.f32 %v1355_v18, %v3581_v2  ;;  %v3743_v27 = vpack.c.b16 %v1266_v20, %v1265_v61 }
 0x105   : > { %v1645_v5 = vpop.f32.mrf.mxu0  ;;  %v1489_v34 = vpop.f32.mrf.mxu3 }
 0x106   : > { %v1569_v8 = vadd.f32 %v1489_v34, %v1435_v23  ;;  %v1207_v34 = vrot.slane %v1205_v47, 4 }
 0x107   : > { %v3734_v62 = vpop.f32.mrf.mxu1 }
 0x108   : > { %2751 = vmatmul.msk.bf16.gmra.mxu0 %vm752_vm3, %v3372_v49  ;;  %v3738_v10 = vadd.f32 %v1645_v5, %v1569_v8  ;;  %v1208_v8 = vrot.slane %v4514_v28, 5 }
 0x109   : > { %v1357_v18 = vpop.f32.mrf.mxu2 }
 0x10a   : > { %v1436_v2 = vadd.f32 %v1357_v18, %v3594_v35  ;;  %2685 = vmatmul.msk.bf16.gmra.mxu1 %vm752_vm3, %v3732_v48  ;;  %v2698_v35 = vrot.slane %v4515_v37, 9  ;;  %v3762_v37 = vld [vmem:[%s3114_s29 + $0xa8] sm:$0xff] }
 0x10b   : > { %4517 = vst [vmem:[#allocation19_spill] sm:$0xff] %v3762_v37 }
 0x10c   : > { %v1206_v20 = vsel %vm3458_vm7, %v2698_v35, %v1205_v47 }
 0x10d   : > { %v1647_v22 = vpop.f32.mrf.mxu0  ;;  %v1491_v11 = vpop.f32.mrf.mxu3 }
 0x10e   : > { %v1570_v23 = vadd.f32 %v1491_v11, %v1436_v2  ;;  %2714 = vmatmul.msk.bf16.gmra.mxu2 %vm752_vm3, %v3743_v27  ;;  %v1209_v2 = vsel %vm3458_vm7, %v1207_v34, %v1208_v8  ;;  %v2902_v34 = vld [vmem:[%s3114_s29 + $0x88] sm:$0xf] }
 0x10f   : > { %v3749_v5 = vpop.f32.mrf.mxu1 }
 0x110   : > { %v3752_v18 = vadd.f32 %v1647_v22, %v1570_v23  ;;  %v1267_v22 = vunpack.c.l.b16 %v1206_v20  ;;  %v1268_v23 = vunpack.c.l.b16 %v1209_v2 }
 0x111   : > { %v1360_v61 = vpop.f32.mrf.mxu2 }
 0x112   : > { %4516 = vst [vmem:[#allocation21_spill] sm:$0xff] %v3752_v18  ;;  %2735 = vmatmul.msk.bf16.gmra.mxu3 %vm752_vm3, %v3639_v17  ;;  %v1437_v4 = vadd.f32 %v1360_v61, %v3611_v56  ;;  %v3773_v8 = vpack.c.b16 %v1268_v23, %v1267_v22  ;;  %v1212_v61 = vrot.slane %v2902_v34, 5 }
 0x114   : > { %4519 = vst [vmem:[#allocation44_spill] sm:$0xff] %v3773_v8 }
 0x115   : > { %v1650_v11 = vpop.f32.mrf.mxu0  ;;  %v1494_v28 = vpop.f32.mrf.mxu3 }
 0x116   : > { %v1571_v49 = vadd.f32 %v1494_v28, %v1437_v4  ;;  %v2903_v28 = vld [vmem:[%s3114_s29 + $0x8c] sm:$0x1] }
 0x117   : > { %v3764_v18 = vpop.f32.mrf.mxu1 }
 0x118   : > { %2752 = vmatmul.msk.bf16.gmra.mxu0 %vm752_vm3, %v3439_v0  ;;  %v3768_v56 = vadd.f32 %v1650_v11, %v1571_v49  ;;  %v1215_v49 = vrot.slane %v2903_v28, 5  ;;  %v2904_v0 = vld [vmem:[%s3114_s29 + $0x84] sm:$0xf] }
 0x119   : > { %v1362_v47 = vpop.f32.mrf.mxu2 }
 0x11a   : > { %4518 = vst [vmem:[#allocation43_spill] sm:$0xff] %v3768_v56  ;;  %v1438_v35 = vadd.f32 %v1362_v47, %v3626_v9  ;;  %2686 = vmatmul.msk.bf16.gmra.mxu1 %vm752_vm3, %v3762_v37  ;;  %v2699_v9 = vrot.slane %v2904_v0, 9  ;;  %v1214_v47 = vrot.slane %v1212_v61, 4  ;;  %v3792_v0 = vld [vmem:[%s3114_s29 + $0xb4] sm:$0xff] }
 0x11c   : > { %v1216_v34 = vsel %vm3458_vm7, %v1214_v47, %v1215_v49  ;;  %v2905_v47 = vld [vmem:[%s3114_s29 + $0x94] sm:$0xf] }
 0x11d   : > { %v1652_v4 = vpop.f32.mrf.mxu0  ;;  %v1496_v20 = vpop.f32.mrf.mxu3 }
 0x11e   : > { %v1572_v2 = vadd.f32 %v1496_v20, %v1438_v35  ;;  %2715 = vmatmul.msk.bf16.gmra.mxu2 %vm752_vm3, %v3773_v8  ;;  %v1213_v35 = vsel %vm3458_vm7, %v2699_v9, %v1212_v61 }
 0x11f   : > { %v3779_v11 = vpop.f32.mrf.mxu1 }
 0x120   : > { %v3782_v17 = vadd.f32 %v1652_v4, %v1572_v2  ;;  %v1269_v4 = vunpack.c.l.b16 %v1213_v35  ;;  %v1270_v2 = vunpack.c.l.b16 %v1216_v34 }
 0x121   : > { %v1365_v22 = vpop.f32.mrf.mxu2 }
 0x122   : > { %4520 = vst [vmem:[#allocation45_spill] sm:$0xff] %v3782_v17  ;;  %2736 = vmatmul.msk.bf16.gmra.mxu3 %vm752_vm3, %v3671_v31  ;;  %v1439_v23 = vadd.f32 %v1365_v22, %v3643_v3  ;;  %v4521_v31 = vld [vmem:[#allocation9_spill] sm:$0xff]  ;;  %v3803_v49 = vpack.c.b16 %v1270_v2, %v1269_v4  ;;  %v1219_v22 = vrot.slane %v2905_v47, 5 }
 0x124   : > { %4523 = vst [vmem:[#allocation47_spill] sm:$0xff] %v3803_v49 }
 0x125   : > { %v1655_v20 = vpop.f32.mrf.mxu0  ;;  %v1499_v28 = vpop.f32.mrf.mxu3 }
 0x126   : > { %v1573_v8 = vadd.f32 %v1499_v28, %v1439_v23  ;;  %v2906_v28 = vld [vmem:[%s3114_s29 + $0x98] sm:$0x1] }
 0x127   : > { %v3794_v17 = vpop.f32.mrf.mxu1 }
 0x128   : > { %2753 = vmatmul.msk.bf16.gmra.mxu0 %vm752_vm3, %v4521_v31  ;;  %v3798_v3 = vadd.f32 %v1655_v20, %v1573_v8  ;;  %v1222_v31 = vrot.slane %v2906_v28, 5  ;;  %v2907_v20 = vld [vmem:[%s3114_s29 + $0x90] sm:$0xf] }
 0x129   : > { %v1367_v61 = vpop.f32.mrf.mxu2 }
 0x12a   : > { %4522 = vst [vmem:[#allocation46_spill] sm:$0xff] %v3798_v3  ;;  %v1440_v9 = vadd.f32 %v1367_v61, %v3658_v12  ;;  %2687 = vmatmul.msk.bf16.gmra.mxu1 %vm752_vm3, %v3792_v0  ;;  %v2700_v3 = vrot.slane %v2907_v20, 9  ;;  %v1221_v12 = vrot.slane %v1219_v22, 4 }
 0x12c   : > { %v1220_v2 = vsel %vm3458_vm7, %v2700_v3, %v1219_v22 }
 0x12d   : > { %v1657_v23 = vpop.f32.mrf.mxu0  ;;  %v1501_v35 = vpop.f32.mrf.mxu3 }
 0x12e   : > { %v1574_v34 = vadd.f32 %v1501_v35, %v1440_v9  ;;  %2716 = vmatmul.msk.bf16.gmra.mxu2 %vm752_vm3, %v3803_v49  ;;  %v1223_v9 = vsel %vm3458_vm7, %v1221_v12, %v1222_v31  ;;  %v1271_v49 = vunpack.c.l.b16 %v1220_v2  ;;  %v4527_v31 = vld [vmem:[#allocation12_spill] sm:$0xff] }
 0x12f   : > { %v3809_v8 = vpop.f32.mrf.mxu1  ;;  %v1272_v20 = vunpack.c.l.b16 %v1223_v9  ;;  %v1226_v22 = vrot.slane %v4527_v31, 5  ;;  %v4528_v9 = vld [vmem:[#allocation13_spill] sm:$0xff] }
 0x130   : > { %v3812_v61 = vadd.f32 %v1657_v23, %v1574_v34  ;;  %v4524_v34 = vld [vmem:[#allocation11_spill] sm:$0xff] }
 0x131   : > { %v1370_v56 = vpop.f32.mrf.mxu2  ;;  %v3828_v3 = vpack.c.b16 %v1272_v20, %v1271_v49 }
 0x132   : > { %2737 = vmatmul.msk.bf16.gmra.mxu3 %vm752_vm3, %v3703_v50  ;;  %v1441_v4 = vadd.f32 %v1370_v56, %v3675_v19 }
 0x133   : > { %4526 = vst [vmem:[#allocation49_spill] sm:$0xff] %v3828_v3 }
 0x135   : > { %v1660_v47 = vpop.f32.mrf.mxu0  ;;  %v1504_v35 = vpop.f32.mrf.mxu3 }
 0x136   : > { %v1575_v28 = vadd.f32 %v1504_v35, %v1441_v4  ;;  %v1229_v35 = vrot.slane %v4528_v9, 5 }
 0x137   : > { %v3821_v23 = vpop.f32.mrf.mxu1 }
 0x138   : > { %2754 = vmatmul.msk.bf16.gmra.mxu0 %vm752_vm3, %v4524_v34  ;;  %v3825_v50 = vadd.f32 %v1660_v47, %v1575_v28  ;;  %v2908_v28 = vld [vmem:[%s3114_s29 + $0x9c] sm:$0xf] }
 0x139   : > { %v1372_v19 = vpop.f32.mrf.mxu2  ;;  %v2701_v34 = vrot.slane %v2908_v28, 9 }
 0x13a   : > { %4525 = vst [vmem:[#allocation48_spill] sm:$0xff] %v3825_v50  ;;  %v1442_v56 = vadd.f32 %v1372_v19, %v3690_v55  ;;  %2761 = vmatmul.msk.bf16.vlgmr.msra.gmra.mxu1 %vm752_vm3, %v3496_v15  ;;  %v1228_v55 = vrot.slane %v1226_v22, 4 }
 0x13b   : > { %v1227_v19 = vsel %vm3458_vm7, %v2701_v34, %v1226_v22  ;;  %v4533_v34 = vld [vmem:[#allocation17_spill] sm:$0xff] }
 0x13c   : > { %v1233_v22 = vrot.slane %v4533_v34, 5 }
 0x13d   : > { %v1662_v12 = vpop.f32.mrf.mxu0  ;;  %v1506_v4 = vpop.f32.mrf.mxu3 }
 0x13e   : > { %v1576_v2 = vadd.f32 %v1506_v4, %v1442_v56  ;;  %2717 = vmatmul.msk.bf16.gmra.mxu2 %vm752_vm3, %v3828_v3  ;;  %v1230_v56 = vsel %vm3458_vm7, %v1228_v55, %v1229_v35  ;;  %v1273_v3 = vunpack.c.l.b16 %v1227_v19  ;;  %v4534_v19 = vld [vmem:[#allocation18_spill] sm:$0xff] }
 0x13f   : > { %v3836_v47 = vpop.f32.mrf.mxu1  ;;  %v1274_v28 = vunpack.c.l.b16 %v1230_v56  ;;  %v1236_v56 = vrot.slane %v4534_v19, 5 }
 0x140   : > { %v3839_v49 = vadd.f32 %v1662_v12, %v1576_v2  ;;  %v4530_v12 = vld [vmem:[#allocation16_spill] sm:$0xff] }
 0x141   : > { %v1375_v20 = vpop.f32.mrf.mxu2 }
 0x142   : > { %4529 = vst [vmem:[#allocation12_spill] sm:$0xff] %v3839_v49  ;;  %2738 = vmatmul.msk.bf16.gmra.mxu3 %vm752_vm3, %v3732_v48  ;;  %v1443_v15 = vadd.f32 %v1375_v20, %v3707_v30  ;;  %v3855_v20 = vpack.c.b16 %v1274_v28, %v1273_v3 }
 0x144   : > { %4532 = vst [vmem:[#allocation50_spill] sm:$0xff] %v3855_v20 }
 0x145   : > { %v1665_v31 = vpop.f32.mrf.mxu0  ;;  %v1509_v4 = vpop.f32.mrf.mxu3 }
 0x146   : > { %v1577_v9 = vadd.f32 %v1509_v4, %v1443_v15  ;;  %v4535_v4 = vld [vmem:[#allocation15_spill] sm:$0xff] }
 0x147   : > { %v3848_v50 = vpop.f32.mrf.mxu1 }
 0x148   : > { %2755 = vmatmul.msk.bf16.gmra.mxu0 %vm752_vm3, %v4530_v12  ;;  %v3852_v2 = vadd.f32 %v1665_v31, %v1577_v9  ;;  %v2702_v9 = vrot.slane %v4535_v4, 9 }
 0x149   : > { %v1377_v48 = vpop.f32.mrf.mxu2 }
 0x14a   : > { %4531 = vst [vmem:[#allocation13_spill] sm:$0xff] %v3852_v2  ;;  %v1444_v30 = vadd.f32 %v1377_v48, %v3722_v6  ;;  %2762 = vmatmul.msk.bf16.gmra.mxu1 %vm752_vm3, %v3513_v41  ;;  %v1235_v48 = vrot.slane %v1233_v22, 4  ;;  %v1060_v6 = vadd.f32 %v3734_v62, %v3560_v14  ;;  %v1234_v34 = vsel %vm3458_vm7, %v2702_v9, %v1233_v22 }
 0x14b   : > { %v1275_v12 = vunpack.c.l.b16 %v1234_v34 }
 0x14d   : > { %v1667_v35 = vpop.f32.mrf.mxu0  ;;  %v1511_v55 = vpop.f32.mrf.mxu3 }
 0x14e   : > { %v1578_v15 = vadd.f32 %v1511_v55, %v1444_v30  ;;  %2718 = vmatmul.msk.bf16.gmra.mxu2 %vm752_vm3, %v3855_v20  ;;  %v1237_v55 = vsel %vm3458_vm7, %v1235_v48, %v1236_v56  ;;  %v3889_v56 = vld [vmem:[%s3114_s29 + $0xc0] sm:$0xf]  ;;  %v3892_v48 = vld [vmem:[%s3114_s29 + $0xc4] sm:$0xf] }
 0x14f   : > { %v3863_v31 = vpop.f32.mrf.mxu1  ;;  %v1276_v14 = vunpack.c.l.b16 %v1237_v55  ;;  %4540 = vst [vmem:[#allocation51_spill] sm:$0xff] %v3889_v56 }
 0x150   : > { %v3868_v3 = vadd.f32 %v1667_v35, %v1578_v15  ;;  %v1062_v35 = vadd.f32 %v3749_v5, %v3568_v21  ;;  %v4537_v15 = vld [vmem:[#allocation23_spill] sm:$0xff]  ;;  %4541 = vst [vmem:[#allocation52_spill] sm:$0xff] %v3892_v48  ;;  %v1602_v5 = vshrl.u32 %v3889_v56, 16 }
 0x151   : > { %v1380_v28 = vpop.f32.mrf.mxu2 }
 0x152   : > { %4536 = vst [vmem:[#allocation17_spill] sm:$0xff] %v3868_v3  ;;  %2739 = vmatmul.msk.bf16.gmra.mxu3 %vm752_vm3, %v3762_v37  ;;  %v1445_v30 = vadd.f32 %v1380_v28, %v1060_v6  ;;  %v3884_v28 = vpack.c.b16 %v1276_v14, %v1275_v12  ;;  %v1615_v12 = vshrl.u32 %v3892_v48, 16  ;;  %v4543_v14 = vld [vmem:[#allocation25_spill] sm:$0xff]  ;;  %v1604_v20 = vrot.slane %v1602_v5, 4 }
 0x154   : > { %4539 = vst [vmem:[#allocation15_spill] sm:$0xff] %v3884_v28 }
 0x155   : > { %v1670_v19 = vpop.f32.mrf.mxu0  ;;  %v1514_v4 = vpop.f32.mrf.mxu3 }
 0x156   : > { %v1579_v2 = vadd.f32 %v1514_v4, %v1445_v30  ;;  %v4542_v30 = vld [vmem:[#allocation24_spill] sm:$0xff] }
 0x157   : > { %v3876_v62 = vpop.f32.mrf.mxu1  ;;  %v1240_v34 = vrot.slane %v4542_v30, 5  ;;  %v4544_v30 = vld [vmem:[#allocation22_spill] sm:$0xff] }
 0x158   : > { %2756 = vmatmul.msk.bf16.gmra.mxu0 %vm752_vm3, %v4537_v15  ;;  %v3882_v6 = vadd.f32 %v1670_v19, %v1579_v2  ;;  %v1605_v2 = vshll.u32 %v3889_v56, 16  ;;  %v1611_v19 = vshll.u32 %v3892_v48, 16  ;;  %v2703_v15 = vrot.slane %v4544_v30, 9 }
 0x159   : > { %v1382_v22 = vpop.f32.mrf.mxu2  ;;  %v1242_v37 = vrot.slane %v1240_v34, 4 }
 0x15a   : > { %4538 = vst [vmem:[#allocation18_spill] sm:$0xff] %v3882_v6  ;;  %v1446_v9 = vadd.f32 %v1382_v22, %v1062_v35  ;;  %2763 = vmatmul.msk.bf16.gmra.mxu1 %vm752_vm3, %v3535_v51  ;;  %v1243_v35 = vrot.slane %v4543_v14, 5  ;;  %v1065_v6 = vadd.f32 %v3764_v18, %v3570_v1  ;;  %v1607_v48 = vrot.slane %v1605_v2, 5  ;;  %v3912_v14 = vld [vmem:[%s3114_s29 + $0xc8] sm:$0x1] }
 0x15b   : > { %v1613_v49 = vrot.slane %v1611_v19, 5  ;;  %v1241_v30 = vsel %vm3458_vm7, %v2703_v15, %v1240_v34  ;;  %v1621_v5 = vshll.u32 %v3912_v14, 16 }
 0x15c   : > { %v1277_v19 = vunpack.c.l.b16 %v1241_v30  ;;  %v3938_v30 = vld [vmem:[%s3114_s29 + $0xc0] sm:$0xff] }
 0x15d   : > { %v1672_v55 = vpop.f32.mrf.mxu0  ;;  %v1516_v21 = vpop.f32.mrf.mxu3 }
 0x15e   : > { %v1580_v4 = vadd.f32 %v1516_v21, %v1446_v9  ;;  %2719 = vmatmul.msk.bf16.gmra.mxu2 %vm752_vm3, %v3884_v28  ;;  %v1617_v9 = vrot.slane %v1615_v12, 4  ;;  %v1244_v28 = vsel %vm3458_vm7, %v1242_v37, %v1243_v35 }
 0x15f   : > { %v3902_v22 = vpop.f32.mrf.mxu1  ;;  %v1278_v12 = vunpack.c.l.b16 %v1244_v28 }
 0x160   : > { %v3907_v56 = vadd.f32 %v1672_v55, %v1580_v4  ;;  %v1608_v55 = vor.u32 %v1607_v48, %v1604_v20  ;;  %v1618_v4 = vor.u32 %v1617_v9, %v1613_v49  ;;  %v1623_v48 = vrot.slane %v1621_v5, 5 }
 0x161   : > { %v1385_v3 = vpop.f32.mrf.mxu2  ;;  %v3927_v35 = vpack.c.b16 %v1278_v12, %v1277_v19 }
 0x162   : > { %4545 = vst [vmem:[#allocation24_spill] sm:$0xff] %v3907_v56  ;;  %2740 = vmatmul.msk.bf16.gmra.mxu3 %vm752_vm3, %v3792_v0  ;;  %v1447_v21 = vadd.f32 %v1385_v3, %v1065_v6  ;;  %v1067_v3 = vadd.f32 %v3779_v11, %v3583_v42  ;;  %v1609_v6 = vrot.slane %v1608_v55, 4  ;;  %v1619_v20 = vrot.slane %v1618_v4, 4 }
 0x164   : > { %v1614_v42 = vsel %vm3148_vm4, %v1609_v6, %v1613_v49  ;;  %v1624_v11 = vsel %vm3148_vm4, %v1619_v20, %v1623_v48 }
 0x165   : > { %v1675_v1 = vpop.f32.mrf.mxu0  ;;  %v1519_v18 = vpop.f32.mrf.mxu3  ;;  %v1627_v55 = vunpack.c.l.b16 %v1614_v42  ;;  %v1628_v4 = vunpack.c.l.b16 %v1624_v11  ;;  %v2909_v42 = vld [vmem:[%s3114_s29 + $0x18] sm:$0xff] }
 0x166   : > { %v1581_v2 = vadd.f32 %v1519_v18, %v1447_v21  ;;  %v1070_v18 = vadd.f32 %v3794_v17, %v3596_v40  ;;  %v1072_v40 = vadd.f32 %v3809_v8, %v3613_v46  ;;  %v1075_v46 = vadd.f32 %v3821_v23, %v3628_v54 }
 0x167   : > { %v3919_v56 = vpop.f32.mrf.mxu1  ;;  %v3948_v19 = vpack.c.b16 %v1628_v4, %v1627_v55 }
 0x168   : > { %2757 = vmatmul.msk.bf16.gmra.mxu0 %vm752_vm3, %v3478_v58  ;;  %v3925_v15 = vadd.f32 %v1675_v1, %v1581_v2 }
 0x169   : > { %v1387_v37 = vpop.f32.mrf.mxu2 }
 0x16a   : > { %v1448_v34 = vadd.f32 %v1387_v37, %v1067_v3  ;;  %2764 = vmatmul.msk.bf16.gmra.mxu1 %vm752_vm3, %v3555_v29 }
 0x16d   : > { %v1677_v28 = vpop.f32.mrf.mxu0  ;;  %v1521_v9 = vpop.f32.mrf.mxu3 }
 0x16e   : > { %v1582_v21 = vadd.f32 %v1521_v9, %v1448_v34  ;;  %2720 = vmatmul.msk.bf16.gmra.mxu2 %vm752_vm3, %v3927_v35 }
 0x16f   : > { %v3940_v1 = vpop.f32.mrf.mxu1 }
 0x170   : > { %v3944_v5 = vadd.f32 %v1677_v28, %v1582_v21 }
 0x171   : > { %v1390_v2 = vpop.f32.mrf.mxu2 }
 0x172   : > { %2741 = vmatmul.msk.bf16.gmra.mxu3 %vm752_vm3, %v3938_v30  ;;  %v1449_v49 = vadd.f32 %v1390_v2, %v1070_v18 }
 0x175   : > { %v1680_v12 = vpop.f32.mrf.mxu0  ;;  %v1524_v3 = vpop.f32.mrf.mxu3 }
 0x176   : > { %v1583_v37 = vadd.f32 %v1524_v3, %v1449_v49 }
 0x177   : > { %v3950_v6 = vpop.f32.mrf.mxu1 }
 0x178   : > { %2758 = vmatmul.msk.bf16.gmra.mxu0 %vm752_vm3, %v3948_v19  ;;  %v3956_v17 = vadd.f32 %v1680_v12, %v1583_v37  ;;  %v1077_v12 = vadd.f32 %v3836_v47, %v3645_v44  ;;  %v1080_v44 = vadd.f32 %v3848_v50, %v3660_v43 }
 0x179   : > { %v1392_v20 = vpop.f32.mrf.mxu2 }
 0x17a   : > { %v1450_v48 = vadd.f32 %v1392_v20, %v1072_v40  ;;  %2765 = vmatmul.msk.bf16.gmra.mxu1 %vm752_vm3, %v3617_v33 }
 0x17d   : > { %v1682_v34 = vpop.f32.mrf.mxu0  ;;  %v1526_v28 = vpop.f32.mrf.mxu3 }
 0x17e   : > { %v1584_v9 = vadd.f32 %v1526_v28, %v1450_v48  ;;  %2782 = vmatmul.msk.bf16.vlgmr.msra.gmra.mxu2 %vm752_vm3, %v2909_v42 }
 0x17f   : > { %v3962_v11 = vpop.f32.mrf.mxu1 }
 0x180   : > { %v3966_v8 = vadd.f32 %v1682_v34, %v1584_v9 }
 0x181   : > { %v1395_v21 = vpop.f32.mrf.mxu2 }
 0x182   : > { %2799 = vmatmul.msk.bf16.vlgmr.msra.gmra.mxu3 %vm752_vm3, %v3352_v52  ;;  %v1451_v18 = vadd.f32 %v1395_v21, %v1075_v46 }
 0x185   : > { %v1685_v55 = vpop.f32.mrf.mxu0  ;;  %v1529_v4 = vpop.f32.mrf.mxu3 }
 0x186   : > { %v1585_v2 = vadd.f32 %v1529_v4, %v1451_v18 }
 0x187   : > { %v3970_v49 = vpop.f32.mrf.mxu1 }
 0x188   : > { %2817 = vmatmul.msk.bf16.vlgmr.msra.gmra.mxu0 %vm752_vm3, %v3513_v41  ;;  %v3976_v3 = vadd.f32 %v1685_v55, %v1585_v2 }
 0x189   : > { %v1397_v54 = vpop.f32.mrf.mxu2 }
 0x18a   : > { %v1452_v23 = vadd.f32 %v1397_v54, %v1077_v12  ;;  %2766 = vmatmul.msk.bf16.gmra.mxu1 %vm752_vm3, %v3649_v59 }
 0x18d   : > { %v1687_v52 = vpop.f32.mrf.mxu0  ;;  %v1531_v37 = vpop.f32.mrf.mxu3 }
 0x18e   : > { %v1586_v40 = vadd.f32 %v1531_v37, %v1452_v23  ;;  %2783 = vmatmul.msk.bf16.gmra.mxu2 %vm752_vm3, %v3435_v60  ;;  %v1082_v60 = vadd.f32 %v3863_v31, %v3677_v7  ;;  %v1085_v7 = vadd.f32 %v3876_v62, %v3692_v38 }
 0x18f   : > { %v3982_v20 = vpop.f32.mrf.mxu1 }
 0x190   : > { %v3986_v47 = vadd.f32 %v1687_v52, %v1586_v40 }
 0x191   : > { %v1400_v41 = vpop.f32.mrf.mxu2 }
 0x192   : > { %2800 = vmatmul.msk.bf16.gmra.mxu3 %vm752_vm3, %v3422_v16  ;;  %v1453_v48 = vadd.f32 %v1400_v41, %v1080_v44 }
 0x195   : > { %v1690_v34 = vpop.f32.mrf.mxu0  ;;  %v1534_v28 = vpop.f32.mrf.mxu3 }
 0x196   : > { %v1587_v9 = vadd.f32 %v1534_v28, %v1453_v48 }
 0x197   : > { %v3990_v42 = vpop.f32.mrf.mxu1 }
 0x198   : > { %2818 = vmatmul.msk.bf16.gmra.mxu0 %vm752_vm3, %v3535_v51  ;;  %v3996_v46 = vadd.f32 %v1690_v34, %v1587_v9 }
 0x199   : > { %v1402_v43 = vpop.f32.mrf.mxu2 }
 0x19a   : > { %v1454_v50 = vadd.f32 %v1402_v43, %v1082_v60  ;;  %2767 = vmatmul.msk.bf16.gmra.mxu1 %vm752_vm3, %v3681_v24  ;;  %v1092_v60 = vadd.f32 %v3940_v1, %v3588_v45  ;;  %v4547_v1 = vld [vmem:[#allocation30_spill] sm:$0xff] }
 0x19d   : > { %v1692_v16 = vpop.f32.mrf.mxu0  ;;  %v1536_v21 = vpop.f32.mrf.mxu3 }
 0x19e   : > { %v1588_v18 = vadd.f32 %v1536_v21, %v1454_v50  ;;  %2784 = vmatmul.msk.bf16.gmra.mxu2 %vm752_vm3, %v3499_v25  ;;  %v1087_v25 = vadd.f32 %v3902_v22, %v3709_v57  ;;  %v1090_v57 = vadd.f32 %v3919_v56, %v3574_v32  ;;  %v4546_v21 = vld [vmem:[#allocation27_spill] sm:$0xff] }
 0x19f   : > { %v4002_v55 = vpop.f32.mrf.mxu1 }
 0x1a0   : > { %v4006_v31 = vadd.f32 %v1692_v16, %v1588_v18  ;;  %v4548_v18 = vld [vmem:[#allocation21_spill] sm:$0xff] }
 0x1a1   : > { %v1405_v51 = vpop.f32.mrf.mxu2 }
 0x1a2   : > { %2801 = vmatmul.msk.bf16.gmra.mxu3 %vm752_vm3, %v3494_v53  ;;  %v1455_v4 = vadd.f32 %v1405_v51, %v1085_v7 }
 0x1a5   : > { %v1695_v2 = vpop.f32.mrf.mxu0  ;;  %v1539_v12 = vpop.f32.mrf.mxu3 }
 0x1a6   : > { %v1589_v54 = vadd.f32 %v1539_v12, %v1455_v4  ;;  %v4549_v4 = vld [vmem:[#allocation8_spill] sm:$0xff] }
 0x1a7   : > { %v4010_v23 = vpop.f32.mrf.mxu1 }
 0x1a8   : > { %2819 = vmatmul.msk.bf16.gmra.mxu0 %vm752_vm3, %v3555_v29  ;;  %v4016_v52 = vadd.f32 %v1695_v2, %v1589_v54 }
 0x1a9   : > { %v1407_v38 = vpop.f32.mrf.mxu2 }
 0x1aa   : > { %v1456_v62 = vadd.f32 %v1407_v38, %v1087_v25  ;;  %2768 = vmatmul.msk.bf16.gmra.mxu1 %vm752_vm3, %v3713_v26 }
 0x1ad   : > { %v1697_v53 = vpop.f32.mrf.mxu0  ;;  %v1541_v37 = vpop.f32.mrf.mxu3 }
 0x1ae   : > { %v1590_v40 = vadd.f32 %v1541_v37, %v1456_v62  ;;  %2785 = vmatmul.msk.bf16.gmra.mxu2 %vm752_vm3, %v3518_v39  ;;  %v4550_v62 = vld [vmem:[#allocation32_spill] sm:$0xff] }
 0x1af   : > { %v4022_v44 = vpop.f32.mrf.mxu1 }
 0x1b0   : > { %v4026_v22 = vadd.f32 %v1697_v53, %v1590_v40  ;;  %v1097_v53 = vadd.f32 %v3962_v11, %v4550_v62 }
 0x1b1   : > { %v1410_v29 = vpop.f32.mrf.mxu2 }
 0x1b2   : > { %2802 = vmatmul.msk.bf16.gmra.mxu3 %vm752_vm3, %v3160_v63  ;;  %v1457_v41 = vadd.f32 %v1410_v29, %v1090_v57 }
 0x1b5   : > { %v1700_v48 = vpop.f32.mrf.mxu0  ;;  %v1544_v34 = vpop.f32.mrf.mxu3 }
 0x1b6   : > { %v1591_v28 = vadd.f32 %v1544_v34, %v1457_v41  ;;  %v4552_v41 = vld [vmem:[#allocation44_spill] sm:$0xff] }
 0x1b7   : > { %v1785_v9 = vpop.f32.mrf.mxu1 }
 0x1b8   : > { %2820 = vmatmul.msk.bf16.gmra.mxu0 %vm752_vm3, %v3617_v33  ;;  %v4035_v39 = vadd.f32 %v1785_v9, %v3738_v10  ;;  %v4037_v32 = vadd.f32 %v1700_v48, %v1591_v28  ;;  %v1095_v33 = vadd.f32 %v3950_v6, %v4547_v1  ;;  %v4551_v6 = vld [vmem:[#allocation43_spill] sm:$0xff]  ;;  %v4553_v9 = vld [vmem:[#allocation28_spill] sm:$0xff] }
 0x1b9   : > { %v1412_v56 = vpop.f32.mrf.mxu2 }
 0x1ba   : > { %v1458_v43 = vadd.f32 %v1412_v56, %v1092_v60  ;;  %2769 = vmatmul.msk.bf16.gmra.mxu1 %vm752_vm3, %v3743_v27  ;;  %v4554_v60 = vld [vmem:[#allocation33_spill] sm:$0xff] }
 0x1bb   : > { %v4555_v56 = vld [vmem:[#allocation45_spill] sm:$0xff] }
 0x1bd   : > { %v1702_v63 = vpop.f32.mrf.mxu0  ;;  %v1546_v50 = vpop.f32.mrf.mxu3 }
 0x1be   : > { %v1592_v16 = vadd.f32 %v1546_v50, %v1458_v43  ;;  %2786 = vmatmul.msk.bf16.gmra.mxu2 %vm752_vm3, %v4546_v21 }
 0x1bf   : > { %v1787_v45 = vpop.f32.mrf.mxu1 }
 0x1c0   : > { %v4046_v10 = vadd.f32 %v1787_v45, %v4548_v18  ;;  %v4048_v7 = vadd.f32 %v1702_v63, %v1592_v16  ;;  %v4556_v16 = vld [vmem:[#allocation10_spill] sm:$0xff] }
 0x1c1   : > { %v1415_v51 = vpop.f32.mrf.mxu2 }
 0x1c2   : > { %2803 = vmatmul.msk.bf16.gmra.mxu3 %vm752_vm3, %v4549_v4  ;;  %v1459_v2 = vadd.f32 %v1415_v51, %v1095_v33  ;;  %v4557_v51 = vld [vmem:[#allocation35_spill] sm:$0xff] }
 0x1c3   : > { %v1102_v4 = vadd.f32 %v3982_v20, %v4557_v51 }
 0x1c5   : > { %v1705_v12 = vpop.f32.mrf.mxu0  ;;  %v1549_v54 = vpop.f32.mrf.mxu3 }
 0x1c6   : > { %v1593_v25 = vadd.f32 %v1549_v54, %v1459_v2 }
 0x1c7   : > { %v1790_v38 = vpop.f32.mrf.mxu1 }
 0x1c8   : > { %2821 = vmatmul.msk.bf16.gmra.mxu0 %vm752_vm3, %v3649_v59  ;;  %v4057_v37 = vadd.f32 %v1790_v38, %v4551_v6  ;;  %v4059_v40 = vadd.f32 %v1705_v12, %v1593_v25  ;;  %v1100_v59 = vadd.f32 %v3970_v49, %v4554_v60  ;;  %v4558_v49 = vld [vmem:[#allocation46_spill] sm:$0xff]  ;;  %v4559_v38 = vld [vmem:[#allocation47_spill] sm:$0xff] }
 0x1c9   : > { %v1417_v57 = vpop.f32.mrf.mxu2 }
 0x1ca   : > { %v1460_v29 = vadd.f32 %v1417_v57, %v1097_v53  ;;  %2770 = vmatmul.msk.bf16.gmra.mxu1 %vm752_vm3, %v4552_v41  ;;  %v4560_v57 = vld [vmem:[#allocation29_spill] sm:$0xff] }
 0x1cd   : > { %v1707_v48 = vpop.f32.mrf.mxu0  ;;  %v1551_v34 = vpop.f32.mrf.mxu3 }
 0x1ce   : > { %v1594_v28 = vadd.f32 %v1551_v34, %v1460_v29  ;;  %2787 = vmatmul.msk.bf16.gmra.mxu2 %vm752_vm3, %v4553_v9  ;;  %v4561_v29 = vld [vmem:[#allocation36_spill] sm:$0xff]  ;;  %v4562_v9 = vld [vmem:[#allocation14_spill] sm:$0xff] }
 0x1cf   : > { %v1792_v11 = vpop.f32.mrf.mxu1 }
 0x1d0   : > { %v4068_v43 = vadd.f32 %v1792_v11, %v4555_v56  ;;  %v4070_v63 = vadd.f32 %v1707_v48, %v1594_v28 }
 0x1d1   : > { %v1420_v50 = vpop.f32.mrf.mxu2 }
 0x1d2   : > { %2804 = vmatmul.msk.bf16.gmra.mxu3 %vm752_vm3, %v4556_v16  ;;  %v1461_v21 = vadd.f32 %v1420_v50, %v1100_v59  ;;  %v4563_v16 = vld [vmem:[#allocation38_spill] sm:$0xff] }
 0x1d5   : > { %v1710_v45 = vpop.f32.mrf.mxu0  ;;  %v1554_v1 = vpop.f32.mrf.mxu3 }
 0x1d6   : > { %v1595_v33 = vadd.f32 %v1554_v1, %v1461_v21  ;;  %v1107_v21 = vadd.f32 %v4002_v55, %v4563_v16  ;;  %v4571_v16 = vld [vmem:[#allocation50_spill] sm:$0xff] }
 0x1d7   : > { %v1795_v18 = vpop.f32.mrf.mxu1 }
 0x1d8   : > { %2822 = vmatmul.msk.bf16.gmra.mxu0 %vm752_vm3, %v3681_v24  ;;  %v4079_v2 = vadd.f32 %v1795_v18, %v4558_v49  ;;  %v4081_v12 = vadd.f32 %v1710_v45, %v1595_v33  ;;  %v1105_v24 = vadd.f32 %v3990_v42, %v4561_v29  ;;  %v4564_v42 = vld [vmem:[#allocation48_spill] sm:$0xff]  ;;  %v4565_v18 = vld [vmem:[#allocation49_spill] sm:$0xff] }
 0x1d9   : > { %v1422_v54 = vpop.f32.mrf.mxu2 }
 0x1da   : > { %v1462_v25 = vadd.f32 %v1422_v54, %v1102_v4  ;;  %2771 = vmatmul.msk.bf16.gmra.mxu1 %vm752_vm3, %v4559_v38  ;;  %v4566_v54 = vld [vmem:[#allocation31_spill] sm:$0xff] }
 0x1dd   : > { %v1712_v62 = vpop.f32.mrf.mxu0  ;;  %v1556_v53 = vpop.f32.mrf.mxu3 }
 0x1de   : > { %v1596_v6 = vadd.f32 %v1556_v53, %v1462_v25  ;;  %2788 = vmatmul.msk.bf16.gmra.mxu2 %vm752_vm3, %v4560_v57  ;;  %v4567_v25 = vld [vmem:[#allocation39_spill] sm:$0xff] }
 0x1df   : > { %v1797_v20 = vpop.f32.mrf.mxu1 }
 0x1e0   : > { %v4090_v48 = vadd.f32 %v1797_v20, %v3812_v61  ;;  %v4092_v34 = vadd.f32 %v1712_v62, %v1596_v6  ;;  %v4568_v62 = vld [vmem:[#allocation12_spill] sm:$0xff] }
 0x1e1   : > { %v1425_v28 = vpop.f32.mrf.mxu2  ;;  %v4569_v20 = vld [vmem:[#allocation20_spill] sm:$0xff] }
 0x1e2   : > { %2805 = vmatmul.msk.bf16.gmra.mxu3 %vm752_vm3, %v4562_v9  ;;  %v1463_v11 = vadd.f32 %v1425_v28, %v1105_v24 }
 0x1e5   : > { %v1715_v60 = vpop.f32.mrf.mxu0  ;;  %v1559_v59 = vpop.f32.mrf.mxu3 }
 0x1e6   : > { %v1597_v56 = vadd.f32 %v1559_v59, %v1463_v11 }
 0x1e7   : > { %v1800_v50 = vpop.f32.mrf.mxu1 }
 0x1e8   : > { %2823 = vmatmul.msk.bf16.gmra.mxu0 %vm752_vm3, %v3713_v26  ;;  %v4101_v61 = vadd.f32 %v1800_v50, %v4564_v42  ;;  %v4103_v45 = vadd.f32 %v1715_v60, %v1597_v56  ;;  %v1110_v26 = vadd.f32 %v4010_v23, %v4567_v25  ;;  %v4570_v60 = vld [vmem:[#allocation41_spill] sm:$0xff] }
 0x1e9   : > { %v1427_v1 = vpop.f32.mrf.mxu2  ;;  %v1112_v59 = vadd.f32 %v4022_v44, %v4570_v60  ;;  %v2449_v44 = vld [vmem:[%s4424_s3 + $0x78] sm:$0xff] }
 0x1ea   : > { %v1464_v33 = vadd.f32 %v1427_v1, %v1107_v21  ;;  %2772 = vmatmul.msk.bf16.gmra.mxu1 %vm752_vm3, %v4565_v18 }
 0x1eb   : > { %2451 = vmatpush.msrb.mxu1 %v2449_v44  ;;  %v4578_v44 = vld [vmem:[#allocation24_spill] sm:$0xff] }
 0x1ed   : > { %v1717_v51 = vpop.f32.mrf.mxu0  ;;  %v1561_v4 = vpop.f32.mrf.mxu3 }
 0x1ee   : > { %v1598_v49 = vadd.f32 %v1561_v4, %v1464_v33  ;;  %2789 = vmatmul.msk.bf16.gmra.mxu2 %vm752_vm3, %v4566_v54  ;;  %v4572_v33 = vld [vmem:[#allocation34_spill] sm:$0xff] }
 0x1ef   : > { %v1802_v55 = vpop.f32.mrf.mxu1 }
 0x1f0   : > { %v4112_v53 = vadd.f32 %v1802_v55, %v4568_v62  ;;  %v4114_v6 = vadd.f32 %v1717_v51, %v1598_v49  ;;  %v4574_v55 = vld [vmem:[#allocation26_spill] sm:$0xff] }
 0x1f1   : > { %v1430_v57 = vpop.f32.mrf.mxu2 }
 0x1f2   : > { %2806 = vmatmul.msk.bf16.gmra.mxu3 %vm752_vm3, %v4569_v20  ;;  %v1465_v29 = vadd.f32 %v1430_v57, %v1110_v26 }
 0x1f5   : > { %v1720_v24 = vpop.f32.mrf.mxu0  ;;  %v1564_v28 = vpop.f32.mrf.mxu3 }
 0x1f6   : > { %v1599_v9 = vadd.f32 %v1564_v28, %v1465_v29 }
 0x1f7   : > { %v4118_v11 = vpop.f32.mrf.mxu1 }
 0x1f8   : > { %2824 = vmatmul.msk.bf16.gmra.mxu0 %vm752_vm3, %v3743_v27  ;;  %v4124_v23 = vadd.f32 %v1720_v24, %v1599_v9  ;;  %v4573_v27 = vld [vmem:[#allocation17_spill] sm:$0xff]  ;;  %v4575_v24 = vld [vmem:[#allocation18_spill] sm:$0xff] }
 0x1f9   : > { %v1432_v56 = vpop.f32.mrf.mxu2 }
 0x1fa   : > { %v1466_v50 = vadd.f32 %v1432_v56, %v1112_v59  ;;  %2773 = vmatmul.msk.bf16.gmra.mxu1 %vm752_vm3, %v4571_v16  ;;  %v4576_v59 = vld [vmem:[#allocation15_spill] sm:$0xff] }
 0x1fd   : > { %v1722_v21 = vpop.f32.mrf.mxu0  ;;  %v1566_v42 = vpop.f32.mrf.mxu3 }
 0x1fe   : > { %v1600_v1 = vadd.f32 %v1566_v42, %v1466_v50  ;;  %2790 = vmatmul.msk.bf16.gmra.mxu2 %vm752_vm3, %v4572_v33  ;;  %v4577_v42 = vld [vmem:[#allocation37_spill] sm:$0xff] }
 0x1ff   : > { %v1807_v51 = vpop.f32.mrf.mxu1 }
 0x200   : > { %v4134_v4 = vadd.f32 %v1807_v51, %v4573_v27  ;;  %v4136_v49 = vadd.f32 %v1722_v21, %v1600_v1 }
 0x201   : > { %v1919_v54 = vpop.f32.mrf.mxu2 }
 0x202   : > { %2807 = vmatmul.msk.bf16.gmra.mxu3 %vm752_vm3, %v4574_v55  ;;  %v1999_v25 = vadd.f32 %v1919_v54, %v4035_v39  ;;  %v4152_v39 = vld [vmem:[%s4423_s2] ss:$0 sm:$0xff]  ;;  %v4579_v55 = vld [vmem:[#allocation9_spill] sm:$0xff] }
 0x205   : > { %v2215_v26 = vpop.f32.mrf.mxu0  ;;  %v2075_v62 = vpop.f32.mrf.mxu3 }
 0x206   : > { %v2155_v57 = vadd.f32 %v2075_v62, %v1999_v25 }
 0x207   : > { %v1810_v20 = vpop.f32.mrf.mxu1 }
 0x208   : > { %2825 = vmatmul.msk.bf16.gmra.mxu0 %vm752_vm3, %v4552_v41  ;;  %v2295_v29 = vadd.f32 %v2215_v26, %v2155_v57  ;;  %v4144_v28 = vadd.f32 %v1810_v20, %v4575_v24  ;;  %v2448_v41 = vld [vmem:[%s4424_s3 + $0x70] sm:$0xff] }
 0x209   : > { %v1921_v9 = vpop.f32.mrf.mxu2  ;;  %2452 = vmatpush.msrb.mxu1 %v2448_v41 }
 0x20a   : > { %v2000_v60 = vadd.f32 %v1921_v9, %v4046_v10  ;;  %2774 = vmatmul.msk.bf16.gmra.mxu1 %vm752_vm3, %v4576_v59  ;;  %v2331_v10 = vadd.f32 %v4152_v39, %v2295_v29  ;;  %v4580_v29 = vld [vmem:[#allocation52_spill] sm:$0xff] }
 0x20c   : > { %v2363_v26 = vmax.f32 %v2331_v10, 0.0 }
 0x20d   : > { %v2217_v56 = vpop.f32.mrf.mxu0  ;;  %v2077_v50 = vpop.f32.mrf.mxu3 }
 0x20e   : > { %v2156_v21 = vadd.f32 %v2077_v50, %v2000_v60  ;;  %2791 = vmatmul.msk.bf16.gmra.mxu2 %vm752_vm3, %v4577_v42 }
 0x20f   : > { %v1812_v1 = vpop.f32.mrf.mxu1 }
 0x210   : > { %v2296_v33 = vadd.f32 %v2217_v56, %v2156_v21  ;;  %v4161_v51 = vadd.f32 %v1812_v1, %v4578_v44  ;;  %v1760_v56 = vrot.slane %v4580_v29, 5  ;;  %v4581_v1 = vld [vmem:[#allocation51_spill] sm:$0xff]  ;;  %v1763_v44 = vrot.slane %v3912_v14, 5 }
 0x211   : > { %v1924_v27 = vpop.f32.mrf.mxu2  ;;  %v2759_v10 = vrot.slane %v4581_v1, 9 }
 0x212   : > { %v2332_v54 = vadd.f32 %v4152_v39, %v2296_v33  ;;  %2808 = vmatmul.msk.bf16.gmra.mxu3 %vm752_vm3, %v4579_v55  ;;  %v2001_v25 = vadd.f32 %v1924_v27, %v4057_v37  ;;  %v1762_v33 = vrot.slane %v1760_v56, 4 }
 0x214   : > { %v2364_v62 = vmax.f32 %v2332_v54, 0.0 }
 0x215   : > { %v2220_v57 = vpop.f32.mrf.mxu0  ;;  %v2080_v20 = vpop.f32.mrf.mxu3 }
 0x216   : > { %v2395_v24 = vadd.f32 %v2364_v62, %v2363_v26  ;;  %v2157_v9 = vadd.f32 %v2080_v20, %v2001_v25  ;;  %v1761_v62 = vsel %vm3458_vm7, %v2759_v10, %v1760_v56 }
 0x217   : > { %v1815_v60 = vpop.f32.mrf.mxu1 }
 0x218   : > { %2826 = vmatmul.msk.bf16.gmra.mxu0 %vm752_vm3, %v4559_v38  ;;  %v2297_v50 = vadd.f32 %v2220_v57, %v2157_v9  ;;  %v4171_v21 = vadd.f32 %v1815_v60, %v3925_v15  ;;  %v4582_v15 = vld [vmem:[#allocation40_spill] sm:$0xff]  ;;  %v1764_v57 = vsel %vm3458_vm7, %v1762_v33, %v1763_v44  ;;  %v4583_v60 = vld [vmem:[#allocation11_spill] sm:$0xff] }
 0x219   : > { %v1926_v42 = vpop.f32.mrf.mxu2 }
 0x21a   : > { %v2333_v41 = vadd.f32 %v4152_v39, %v2297_v50  ;;  %v2002_v37 = vadd.f32 %v1926_v42, %v4068_v43  ;;  %2775 = vmatmul.msk.bf16.gmra.mxu1 %vm752_vm3, %v3927_v35  ;;  %v2447_v43 = vld [vmem:[%s4424_s3 + $0x68] sm:$0xff]  ;;  %v1767_v50 = vunpack.c.l.b16 %v1761_v62  ;;  %v1768_v42 = vunpack.c.l.b16 %v1764_v57  ;;  %v4584_v62 = vld [vmem:[#allocation42_spill] sm:$0xff] }
 0x21b   : > { %2453 = vmatpush.msrb.mxu1 %v2447_v43 }
 0x21c   : > { %v2365_v27 = vmax.f32 %v2333_v41, 0.0  ;;  %v4195_v33 = vpack.c.b16 %v1768_v42, %v1767_v50 }
 0x21d   : > { %v2222_v54 = vpop.f32.mrf.mxu0  ;;  %v2082_v38 = vpop.f32.mrf.mxu3 }
 0x21e   : > { %v2396_v55 = vadd.f32 %v2395_v24, %v2365_v27  ;;  %v2158_v25 = vadd.f32 %v2082_v38, %v2002_v37  ;;  %2792 = vmatmul.msk.bf16.gmra.mxu2 %vm752_vm3, %v4582_v15 }
 0x21f   : > { %v1817_v26 = vpop.f32.mrf.mxu1 }
 0x220   : > { %v2298_v14 = vadd.f32 %v2222_v54, %v2158_v25  ;;  %v4189_v20 = vadd.f32 %v1817_v26, %v3944_v5 }
 0x221   : > { %v1929_v24 = vpop.f32.mrf.mxu2 }
 0x222   : > { %v2334_v9 = vadd.f32 %v4152_v39, %v2298_v14  ;;  %2809 = vmatmul.msk.bf16.gmra.mxu3 %vm752_vm3, %v4583_v60  ;;  %v2003_v29 = vadd.f32 %v1929_v24, %v4079_v2 }
 0x224   : > { %v2366_v41 = vmax.f32 %v2334_v9, 0.0  ;;  %v4585_v9 = vld [vmem:[#allocation16_spill] sm:$0xff] }
 0x225   : > { %v2225_v56 = vpop.f32.mrf.mxu0  ;;  %v2085_v37 = vpop.f32.mrf.mxu3 }
 0x226   : > { %v2397_v1 = vadd.f32 %v2396_v55, %v2366_v41  ;;  %v2159_v10 = vadd.f32 %v2085_v37, %v2003_v29 }
 0x227   : > { %v1820_v44 = vpop.f32.mrf.mxu1 }
 0x228   : > { %2827 = vmatmul.msk.bf16.gmra.mxu0 %vm752_vm3, %v4565_v18  ;;  %v2299_v5 = vadd.f32 %v2225_v56, %v2159_v10  ;;  %v4200_v27 = vadd.f32 %v1820_v44, %v3956_v17  ;;  %v2446_v17 = vld [vmem:[%s4424_s3 + $0x60] sm:$0xff] }
 0x229   : > { %v1931_v54 = vpop.f32.mrf.mxu2  ;;  %2454 = vmatpush.msrb.mxu1 %v2446_v17 }
 0x22a   : > { %v2335_v2 = vadd.f32 %v4152_v39, %v2299_v5  ;;  %v2004_v38 = vadd.f32 %v1931_v54, %v4090_v48  ;;  %2776 = vmatmul.msk.bf16.gmra.mxu1 %vm752_vm3, %v4195_v33 }
 0x22c   : > { %v2367_v55 = vmax.f32 %v2335_v2, 0.0 }
 0x22d   : > { %v2227_v25 = vpop.f32.mrf.mxu0  ;;  %v2087_v15 = vpop.f32.mrf.mxu3 }
 0x22e   : > { %v2398_v43 = vadd.f32 %v2397_v1, %v2367_v55  ;;  %v2160_v26 = vadd.f32 %v2087_v15, %v2004_v38  ;;  %2793 = vmatmul.msk.bf16.gmra.mxu2 %vm752_vm3, %v4584_v62 }
 0x22f   : > { %v1822_v18 = vpop.f32.mrf.mxu1 }
 0x230   : > { %v2300_v57 = vadd.f32 %v2227_v25, %v2160_v26  ;;  %v4212_v48 = vadd.f32 %v1822_v18, %v3966_v8  ;;  %v4586_v25 = vld [vmem:[#allocation19_spill] sm:$0xff] }
 0x231   : > { %v1934_v14 = vpop.f32.mrf.mxu2  ;;  %v4588_v18 = vld [vmem:[#allocation23_spill] sm:$0xff] }
 0x232   : > { %v2336_v24 = vadd.f32 %v4152_v39, %v2300_v57  ;;  %2810 = vmatmul.msk.bf16.gmra.mxu3 %vm752_vm3, %v4585_v9  ;;  %v2005_v60 = vadd.f32 %v1934_v14, %v4101_v61 }
 0x234   : > { %v2368_v29 = vmax.f32 %v2336_v24, 0.0 }
 0x235   : > { %v2230_v50 = vpop.f32.mrf.mxu0  ;;  %v2090_v42 = vpop.f32.mrf.mxu3 }
 0x236   : > { %v2399_v41 = vadd.f32 %v2398_v43, %v2368_v29  ;;  %v2161_v56 = vadd.f32 %v2090_v42, %v2005_v60 }
 0x237   : > { %v1825_v37 = vpop.f32.mrf.mxu1 }
 0x238   : > { %2828 = vmatmul.msk.bf16.gmra.mxu0 %vm752_vm3, %v4571_v16  ;;  %v2301_v1 = vadd.f32 %v2230_v50, %v2161_v56  ;;  %v4221_v8 = vadd.f32 %v1825_v37, %v3976_v3  ;;  %v2445_v16 = vld [vmem:[%s4424_s3 + $0x58] sm:$0xff]  ;;  %v4587_v3 = vld [vmem:[#allocation13_spill] sm:$0xff] }
 0x239   : > { %v1936_v10 = vpop.f32.mrf.mxu2  ;;  %2455 = vmatpush.msrb.mxu1 %v2445_v16  ;;  %v1873_v43 = vadd.f32 %v4118_v11, %v4587_v3 }
 0x23a   : > { %v2337_v44 = vadd.f32 %v4152_v39, %v2301_v1  ;;  %v2006_v5 = vadd.f32 %v1936_v10, %v4112_v53 }
 0x23c   : > { %v2369_v54 = vmax.f32 %v2337_v44, 0.0 }
 0x23d   : > { %v2232_v61 = vpop.f32.mrf.mxu0  ;;  %v2092_v2 = vpop.f32.mrf.mxu3 }
 0x23e   : > { %v2400_v38 = vadd.f32 %v2399_v41, %v2369_v54  ;;  %v2162_v55 = vadd.f32 %v2092_v2, %v2006_v5  ;;  %2794 = vmatmul.msk.bf16.gmra.mxu2 %vm752_vm3, %v4586_v25  ;;  %v4261_v25 = vld [vmem:[%s3114_s29 + $0xd0] sm:$0xf] }
 0x23f   : > { %v1827_v15 = vpop.f32.mrf.mxu1 }
 0x240   : > { %v2302_v26 = vadd.f32 %v2232_v61, %v2162_v55  ;;  %v4233_v53 = vadd.f32 %v1827_v15, %v3986_v47 }
 0x241   : > { %v1939_v62 = vpop.f32.mrf.mxu2 }
 0x242   : > { %v2338_v17 = vadd.f32 %v4152_v39, %v2302_v26  ;;  %2811 = vmatmul.msk.bf16.gmra.mxu3 %vm752_vm3, %v4588_v18  ;;  %v2007_v57 = vadd.f32 %v1939_v62, %v1873_v43 }
 0x244   : > { %v2370_v14 = vmax.f32 %v2338_v17, 0.0  ;;  %v2041_v17 = vshll.u32 %v4261_v25, 16 }
 0x245   : > { %v2235_v24 = vpop.f32.mrf.mxu0  ;;  %v2095_v9 = vpop.f32.mrf.mxu3 }
 0x246   : > { %v2401_v60 = vadd.f32 %v2400_v38, %v2370_v14  ;;  %v2163_v29 = vadd.f32 %v2095_v9, %v2007_v57 }
 0x247   : > { %v1830_v50 = vpop.f32.mrf.mxu1 }
 0x248   : > { %2829 = vmatmul.msk.bf16.gmra.mxu0 %vm752_vm3, %v4576_v59  ;;  %v2303_v11 = vadd.f32 %v2235_v24, %v2163_v29  ;;  %v4241_v47 = vadd.f32 %v1830_v50, %v3996_v46  ;;  %v2444_v46 = vld [vmem:[%s4424_s3 + $0x50] sm:$0xff]  ;;  %v2043_v29 = vrot.slane %v2041_v17, 5 }
 0x249   : > { %v1941_v42 = vpop.f32.mrf.mxu2  ;;  %2456 = vmatpush.msrb.mxu1 %v2444_v46 }
 0x24a   : > { %v2339_v41 = vadd.f32 %v4152_v39, %v2303_v11  ;;  %v2008_v56 = vadd.f32 %v1941_v42, %v4134_v4  ;;  %v313_v42 = vld [vmem:[%s3114_s29 + $0xd4] sm:$0x1] }
 0x24b   : > { %v2193_v17 = vrot.slane %v313_v42, 5 }
 0x24c   : > { %v2371_v37 = vmax.f32 %v2339_v41, 0.0 }
 0x24d   : > { %v2237_v1 = vpop.f32.mrf.mxu0  ;;  %v2097_v10 = vpop.f32.mrf.mxu3 }
 0x24e   : > { %v2402_v44 = vadd.f32 %v2401_v60, %v2371_v37  ;;  %v2164_v5 = vadd.f32 %v2097_v10, %v2008_v56  ;;  %2795 = vmatmul.msk.bf16.gmra.mxu2 %vm752_vm3, %v3792_v0  ;;  %v4258_v0 = vld [vmem:[%s3114_s29 + $0xcc] sm:$0xf] }
 0x24f   : > { %v1832_v59 = vpop.f32.mrf.mxu1  ;;  %v2035_v62 = vshll.u32 %v4258_v0, 16 }
 0x250   : > { %v2304_v54 = vadd.f32 %v2237_v1, %v2164_v5  ;;  %v4251_v61 = vadd.f32 %v1832_v59, %v4006_v31  ;;  %v2032_v31 = vshrl.u32 %v4258_v0, 16 }
 0x251   : > { %v1944_v4 = vpop.f32.mrf.mxu2  ;;  %v2037_v60 = vrot.slane %v2035_v62, 5 }
 0x252   : > { %v2340_v2 = vadd.f32 %v4152_v39, %v2304_v54  ;;  %2812 = vmatmul.msk.bf16.gmra.mxu3 %vm752_vm3, %v3478_v58  ;;  %v2009_v38 = vadd.f32 %v1944_v4, %v4144_v28  ;;  %v2045_v58 = vshrl.u32 %v4261_v25, 16  ;;  %v2034_v9 = vrot.slane %v2032_v31, 4 }
 0x253   : > { %v2815_v31 = vrot.slane %v4258_v0, 9 }
 0x254   : > { %v2372_v55 = vmax.f32 %v2340_v2, 0.0  ;;  %v2047_v50 = vrot.slane %v2045_v58, 4 }
 0x255   : > { %v2240_v16 = vpop.f32.mrf.mxu0  ;;  %v2100_v15 = vpop.f32.mrf.mxu3 }
 0x256   : > { %v2403_v3 = vadd.f32 %v2402_v44, %v2372_v55  ;;  %v2165_v43 = vadd.f32 %v2100_v15, %v2009_v38  ;;  %v2048_v10 = vor.u32 %v2047_v50, %v2043_v29 }
 0x257   : > { %v1835_v26 = vpop.f32.mrf.mxu1 }
 0x258   : > { %2830 = vmatmul.msk.bf16.gmra.mxu0 %vm752_vm3, %v3927_v35  ;;  %v2305_v28 = vadd.f32 %v2240_v16, %v2165_v43  ;;  %v4270_v18 = vadd.f32 %v1835_v26, %v4016_v52  ;;  %v2443_v35 = vld [vmem:[%s4424_s3 + $0x48] sm:$0xff]  ;;  %v2038_v52 = vor.u32 %v2037_v60, %v2034_v9  ;;  %v2049_v4 = vrot.slane %v2048_v10, 4 }
 0x259   : > { %v1946_v57 = vpop.f32.mrf.mxu2  ;;  %2457 = vmatpush.msrb.mxu1 %v2443_v35  ;;  %v2190_v16 = vrot.slane %v4261_v25, 5 }
 0x25a   : > { %v2341_v14 = vadd.f32 %v4152_v39, %v2305_v28  ;;  %v2010_v24 = vadd.f32 %v1946_v57, %v4161_v51  ;;  %v2051_v51 = vshll.u32 %v313_v42, 16  ;;  %v2039_v54 = vrot.slane %v2038_v52, 4  ;;  %v2852_v28 = vld [vmem:[%s3114_s29 + $0xcc] sm:$0xff] }
 0x25b   : > { %v2192_v62 = vrot.slane %v2190_v16, 4  ;;  %v2191_v60 = vsel %vm3458_vm7, %v2815_v31, %v2190_v16 }
 0x25c   : > { %v2373_v11 = vmax.f32 %v2341_v14, 0.0  ;;  %v2044_v43 = vsel %vm3148_vm4, %v2039_v54, %v2043_v29  ;;  %v2197_v42 = vunpack.c.l.b16 %v2191_v60 }
 0x25d   : > { %v2242_v41 = vpop.f32.mrf.mxu0  ;;  %v2102_v56 = vpop.f32.mrf.mxu3  ;;  %v2057_v57 = vunpack.c.l.b16 %v2044_v43 }
 0x25e   : > { %v2404_v37 = vadd.f32 %v2403_v3, %v2373_v11  ;;  %v2166_v1 = vadd.f32 %v2102_v56, %v2010_v24  ;;  %2796 = vmatmul.msk.bf16.gmra.mxu2 %vm752_vm3, %v3938_v30  ;;  %v2053_v30 = vrot.slane %v2051_v51, 5 }
 0x260   : > { %v2306_v44 = vadd.f32 %v2242_v41, %v2166_v1  ;;  %v2054_v26 = vsel %vm3148_vm4, %v2049_v4, %v2053_v30 }
 0x261   : > { %v1949_v5 = vpop.f32.mrf.mxu2  ;;  %v2058_v14 = vunpack.c.l.b16 %v2054_v26 }
 0x262   : > { %v2342_v46 = vadd.f32 %v4152_v39, %v2306_v44  ;;  %2813 = vmatmul.msk.bf16.gmra.mxu3 %vm752_vm3, %v3948_v19  ;;  %v2011_v59 = vadd.f32 %v1949_v5, %v4171_v21 }
 0x263   : > { %v2059_v50 = vpack.c.b16 %v2058_v14, %v2057_v57 }
 0x264   : > { %v2374_v2 = vmax.f32 %v2342_v46, 0.0 }
 0x265   : > { %v2245_v38 = vpop.f32.mrf.mxu0  ;;  %v2105_v55 = vpop.f32.mrf.mxu3 }
 0x266   : > { %v2405_v15 = vadd.f32 %v2404_v37, %v2374_v2  ;;  %v2167_v3 = vadd.f32 %v2105_v55, %v2011_v59 }
 0x268   : > { %2831 = vmatmul.msk.bf16.gmra.mxu0 %vm752_vm3, %v4195_v33  ;;  %v2307_v19 = vadd.f32 %v2245_v38, %v2167_v3  ;;  %v2194_v33 = vsel %vm3458_vm7, %v2192_v62, %v2193_v17 }
 0x269   : > { %v1951_v21 = vpop.f32.mrf.mxu2  ;;  %v2198_v41 = vunpack.c.l.b16 %v2194_v33 }
 0x26a   : > { %v2343_v58 = vadd.f32 %v4152_v39, %v2307_v19  ;;  %v2012_v25 = vadd.f32 %v1951_v21, %v4189_v20  ;;  %v2442_v20 = vld [vmem:[%s4424_s3 + $0x40] sm:$0xff] }
 0x26b   : > { %2458 = vmatpush.msrb.mxu1 %v2442_v20  ;;  %v2199_v35 = vpack.c.b16 %v2198_v41, %v2197_v42 }
 0x26c   : > { %v2375_v24 = vmax.f32 %v2343_v58, 0.0 }
 0x26d   : > { %v2247_v9 = vpop.f32.mrf.mxu0  ;;  %v2107_v36 = vpop.f32.mrf.mxu3 }
 0x26e   : > { %v2406_v29 = vadd.f32 %v2405_v15, %v2375_v24  ;;  %v2168_v0 = vadd.f32 %v2107_v36, %v2012_v25  ;;  %2797 = vmatmul.msk.bf16.gmra.mxu2 %vm752_vm3, %v2852_v28  ;;  %v1837_v36 = vpop.f32.mrf.mxu1 }
 0x270   : > { %v2308_v11 = vadd.f32 %v2247_v9, %v2168_v0 }
 0x271   : > { %v1954_v56 = vpop.f32.mrf.mxu2 }
 0x272   : > { %v2344_v37 = vadd.f32 %v4152_v39, %v2308_v11  ;;  %2814 = vmatmul.msk.bf16.gmra.mxu3 %vm752_vm3, %v2059_v50  ;;  %v2013_v13 = vadd.f32 %v1954_v56, %v4200_v27  ;;  %v2441_v27 = vld [vmem:[%s4424_s3 + $0x38] sm:$0xff] }
 0x273   : > { %2459 = vmatpush.msrb.mxu1 %v2441_v27  ;;  %v1886_v27 = vadd.f32 %v1837_v36, %v4026_v22 }
 0x274   : > { %v2376_v1 = vmax.f32 %v2344_v37, 0.0 }
 0x275   : > { %v2250_v52 = vpop.f32.mrf.mxu0  ;;  %v2110_v10 = vpop.f32.mrf.mxu3 }
 0x276   : > { %v2407_v51 = vadd.f32 %v2406_v29, %v2376_v1  ;;  %v2169_v44 = vadd.f32 %v2110_v10, %v2013_v13  ;;  %v1840_v37 = vpop.f32.mrf.mxu1 }
 0x278   : > { %2832 = vmatmul.msk.bf16.gmra.mxu0 %vm752_vm3, %v2199_v35  ;;  %v2309_v5 = vadd.f32 %v2250_v52, %v2169_v44 }
 0x279   : > { %v1956_v46 = vpop.f32.mrf.mxu2 }
 0x27a   : > { %v2345_v59 = vadd.f32 %v4152_v39, %v2309_v5  ;;  %v2014_v54 = vadd.f32 %v1956_v46, %v4212_v48 }
 0x27c   : > { %v2377_v4 = vmax.f32 %v2345_v59, 0.0 }
 0x27d   : > { %v2252_v30 = vpop.f32.mrf.mxu0  ;;  %v2112_v2 = vpop.f32.mrf.mxu3 }
 0x27e   : > { %v2408_v38 = vadd.f32 %v2407_v51, %v2377_v4  ;;  %v2170_v55 = vadd.f32 %v2112_v2, %v2014_v54  ;;  %v1842_v4 = vpop.f32.mrf.mxu1 }
 0x27f   : > { %v1888_v36 = vadd.f32 %v1842_v4, %v4048_v7 }
 0x280   : > { %v2310_v16 = vadd.f32 %v2252_v30, %v2170_v55 }
 0x281   : > { %v1959_v15 = vpop.f32.mrf.mxu2 }
 0x282   : > { %v2346_v3 = vadd.f32 %v4152_v39, %v2310_v16  ;;  %v2015_v43 = vadd.f32 %v1959_v15, %v4221_v8  ;;  %v2440_v8 = vld [vmem:[%s4424_s3 + $0x30] sm:$0xff] }
 0x283   : > { %2460 = vmatpush.msrb.mxu1 %v2440_v8 }
 0x284   : > { %v2378_v26 = vmax.f32 %v2346_v3, 0.0 }
 0x285   : > { %v2255_v19 = vpop.f32.mrf.mxu0  ;;  %v2115_v21 = vpop.f32.mrf.mxu3 }
 0x286   : > { %v2409_v48 = vadd.f32 %v2408_v38, %v2378_v26  ;;  %v2171_v31 = vadd.f32 %v2115_v21, %v2015_v43 }
 0x288   : > { %v2311_v62 = vadd.f32 %v2255_v19, %v2171_v31 }
 0x289   : > { %v1961_v17 = vpop.f32.mrf.mxu2 }
 0x28a   : > { %v2347_v58 = vadd.f32 %v4152_v39, %v2311_v62  ;;  %v2016_v25 = vadd.f32 %v1961_v17, %v4233_v53  ;;  %v1887_v17 = vadd.f32 %v1840_v37, %v4037_v32 }
 0x28c   : > { %v2379_v28 = vmax.f32 %v2347_v58, 0.0 }
 0x28d   : > { %v2257_v57 = vpop.f32.mrf.mxu0  ;;  %v2117_v14 = vpop.f32.mrf.mxu3 }
 0x28e   : > { %v2410_v24 = vadd.f32 %v2409_v48, %v2379_v28  ;;  %v2172_v9 = vadd.f32 %v2117_v14, %v2016_v25  ;;  %v1845_v48 = vpop.f32.mrf.mxu1 }
 0x290   : > { %v2312_v60 = vadd.f32 %v2257_v57, %v2172_v9 }
 0x291   : > { %v1964_v33 = vpop.f32.mrf.mxu2 }
 0x292   : > { %v2348_v29 = vadd.f32 %v4152_v39, %v2312_v60  ;;  %v2017_v0 = vadd.f32 %v1964_v33, %v4241_v47  ;;  %v2439_v47 = vld [vmem:[%s4424_s3 + $0x28] sm:$0xff] }
 0x293   : > { %2461 = vmatpush.msrb.mxu1 %v2439_v47 }
 0x294   : > { %v2380_v50 = vmax.f32 %v2348_v29, 0.0 }
 0x295   : > { %v2260_v20 = vpop.f32.mrf.mxu0  ;;  %v2120_v53 = vpop.f32.mrf.mxu3 }
 0x296   : > { %v2411_v11 = vadd.f32 %v2410_v24, %v2380_v50  ;;  %v2173_v42 = vadd.f32 %v2120_v53, %v2017_v0  ;;  %v1847_v60 = vpop.f32.mrf.mxu1 }
 0x298   : > { %v2313_v41 = vadd.f32 %v2260_v20, %v2173_v42 }
 0x299   : > { %v1966_v56 = vpop.f32.mrf.mxu2 }
 0x29a   : > { %v2349_v13 = vadd.f32 %v4152_v39, %v2313_v41  ;;  %v2018_v1 = vadd.f32 %v1966_v56, %v4251_v61  ;;  %v2437_v41 = vld [vmem:[%s4424_s3 + $0x18] sm:$0xff]  ;;  %v1889_v56 = vadd.f32 %v1845_v48, %v4059_v40 }
 0x29c   : > { %v2381_v35 = vmax.f32 %v2349_v13, 0.0 }
 0x29d   : > { %v2262_v52 = vpop.f32.mrf.mxu0  ;;  %v2122_v10 = vpop.f32.mrf.mxu3 }
 0x29e   : > { %v2412_v51 = vadd.f32 %v2411_v11, %v2381_v35  ;;  %v2174_v44 = vadd.f32 %v2122_v10, %v2018_v1  ;;  %v1850_v13 = vpop.f32.mrf.mxu1 }
 0x2a0   : > { %v2314_v5 = vadd.f32 %v2262_v52, %v2174_v44 }
 0x2a1   : > { %v1969_v46 = vpop.f32.mrf.mxu2 }
 0x2a2   : > { %v2350_v59 = vadd.f32 %v4152_v39, %v2314_v5  ;;  %v2019_v54 = vadd.f32 %v1969_v46, %v4270_v18  ;;  %v2438_v18 = vld [vmem:[%s4424_s3 + $0x20] sm:$0xff]  ;;  %v1890_v5 = vadd.f32 %v1847_v60, %v4070_v63 }
 0x2a3   : > { %2462 = vmatpush.msrb.mxu1 %v2438_v18 }
 0x2a4   : > { %v2382_v30 = vmax.f32 %v2350_v59, 0.0 }
 0x2a5   : > { %v2265_v2 = vpop.f32.mrf.mxu0  ;;  %v2125_v61 = vpop.f32.mrf.mxu3  ;;  %2463 = vmatpush.msrb.mxu1 %v2437_v41 }
 0x2a6   : > { %v2413_v38 = vadd.f32 %v2412_v51, %v2382_v30  ;;  %v2175_v55 = vadd.f32 %v2125_v61, %v2019_v54  ;;  %v1852_v30 = vpop.f32.mrf.mxu1 }
 0x2a7   : > { %v1892_v18 = vadd.f32 %v1852_v30, %v4092_v34 }
 0x2a8   : > { %v2315_v16 = vadd.f32 %v2265_v2, %v2175_v55 }
 0x2a9   : > { %v1971_v15 = vpop.f32.mrf.mxu2 }
 0x2aa   : > { %v2351_v3 = vadd.f32 %v4152_v39, %v2315_v16  ;;  %v2020_v43 = vadd.f32 %v1971_v15, %v1886_v27  ;;  %v2436_v27 = vld [vmem:[%s4424_s3 + $0x10] sm:$0xff]  ;;  %v1891_v16 = vadd.f32 %v1850_v13, %v4081_v12 }
 0x2ab   : > { %2464 = vmatpush.msrb.mxu1 %v2436_v27 }
 0x2ac   : > { %v2383_v26 = vmax.f32 %v2351_v3, 0.0 }
 0x2ad   : > { %v2267_v19 = vpop.f32.mrf.mxu0  ;;  %v2127_v21 = vpop.f32.mrf.mxu3 }
 0x2ae   : > { %v2414_v31 = vadd.f32 %v2413_v38, %v2383_v26  ;;  %v2176_v62 = vadd.f32 %v2127_v21, %v2020_v43  ;;  %v1855_v48 = vpop.f32.mrf.mxu1 }
 0x2b0   : > { %v2316_v58 = vadd.f32 %v2267_v19, %v2176_v62 }
 0x2b1   : > { %v1974_v22 = vpop.f32.mrf.mxu2 }
 0x2b2   : > { %v2352_v25 = vadd.f32 %v4152_v39, %v2316_v58  ;;  %v2021_v28 = vadd.f32 %v1974_v22, %v1887_v17 }
 0x2b4   : > { %v2384_v57 = vmax.f32 %v2352_v25, 0.0 }
 0x2b5   : > { %v2270_v14 = vpop.f32.mrf.mxu0  ;;  %v2130_v24 = vpop.f32.mrf.mxu3 }
 0x2b6   : > { %v2415_v9 = vadd.f32 %v2414_v31, %v2384_v57  ;;  %v2177_v8 = vadd.f32 %v2130_v24, %v2021_v28 }
 0x2b8   : > { %v2317_v33 = vadd.f32 %v2270_v14, %v2177_v8  ;;  %v1893_v8 = vadd.f32 %v1855_v48, %v4103_v45 }
 0x2b9   : > { %v1976_v29 = vpop.f32.mrf.mxu2 }
 0x2ba   : > { %v2353_v0 = vadd.f32 %v4152_v39, %v2317_v33  ;;  %v2022_v50 = vadd.f32 %v1976_v29, %v1888_v36  ;;  %v1857_v36 = vpop.f32.mrf.mxu1 }
 0x2bc   : > { %v2385_v20 = vmax.f32 %v2353_v0, 0.0 }
 0x2bd   : > { %v2272_v32 = vpop.f32.mrf.mxu0  ;;  %v2132_v53 = vpop.f32.mrf.mxu3 }
 0x2be   : > { %v2416_v11 = vadd.f32 %v2415_v9, %v2385_v20  ;;  %v2178_v42 = vadd.f32 %v2132_v53, %v2022_v50  ;;  %v2435_v9 = vld [vmem:[%s4424_s3 + $0x8] sm:$0xff] }
 0x2bf   : > { %2465 = vmatpush.msrb.mxu1 %v2435_v9 }
 0x2c0   : > { %v2318_v37 = vadd.f32 %v2272_v32, %v2178_v42 }
 0x2c1   : > { %v1979_v7 = vpop.f32.mrf.mxu2 }
 0x2c2   : > { %v2354_v1 = vadd.f32 %v4152_v39, %v2318_v37  ;;  %v2023_v35 = vadd.f32 %v1979_v7, %v1889_v56  ;;  %v1860_v56 = vpop.f32.mrf.mxu1 }
 0x2c4   : > { %v2386_v52 = vmax.f32 %v2354_v1, 0.0 }
 0x2c5   : > { %v2275_v10 = vpop.f32.mrf.mxu0  ;;  %v2135_v51 = vpop.f32.mrf.mxu3 }
 0x2c6   : > { %v2417_v44 = vadd.f32 %v2416_v11, %v2386_v52  ;;  %v2179_v47 = vadd.f32 %v2135_v51, %v2023_v35  ;;  %v1894_v11 = vadd.f32 %v1857_v36, %v4114_v6 }
 0x2c8   : > { %v2319_v46 = vadd.f32 %v2275_v10, %v2179_v47  ;;  %v1895_v10 = vadd.f32 %v1860_v56, %v4124_v23 }
 0x2c9   : > { %v1981_v59 = vpop.f32.mrf.mxu2 }
 0x2ca   : > { %v2355_v54 = vadd.f32 %v4152_v39, %v2319_v46  ;;  %v2024_v4 = vadd.f32 %v1981_v59, %v1890_v5  ;;  %v1862_v46 = vpop.f32.mrf.mxu1 }
 0x2cc   : > { %v2387_v40 = vmax.f32 %v2355_v54, 0.0 }
 0x2cd   : > { %v2277_v2 = vpop.f32.mrf.mxu0  ;;  %v2137_v61 = vpop.f32.mrf.mxu3 }
 0x2ce   : > { %v2418_v38 = vadd.f32 %v2417_v44, %v2387_v40  ;;  %v2180_v55 = vadd.f32 %v2137_v61, %v2024_v4  ;;  %v2434_v44 = vld [vmem:[%s4424_s3] sm:$0xff] }
 0x2cf   : > { %2466 = vmatpush.msrb.mxu1 %v2434_v44 }
 0x2d0   : > { %v2320_v15 = vadd.f32 %v2277_v2, %v2180_v55  ;;  %v1896_v2 = vadd.f32 %v1862_v46, %v4136_v49 }
 0x2d1   : > { %v1984_v63 = vpop.f32.mrf.mxu2 }
 0x2d2   : > { %v2356_v3 = vadd.f32 %v4152_v39, %v2320_v15  ;;  %v2025_v43 = vadd.f32 %v1984_v63, %v1891_v16 }
 0x2d4   : > { %v2388_v26 = vmax.f32 %v2356_v3, 0.0 }
 0x2d5   : > { %v2280_v19 = vpop.f32.mrf.mxu0  ;;  %v2140_v21 = vpop.f32.mrf.mxu3 }
 0x2d6   : > { %v2419_v31 = vadd.f32 %v2418_v38, %v2388_v26  ;;  %v2181_v62 = vadd.f32 %v2140_v21, %v2025_v43 }
 0x2d8   : > { %v2321_v17 = vadd.f32 %v2280_v19, %v2181_v62 }
 0x2d9   : > { %v1986_v58 = vpop.f32.mrf.mxu2 }
 0x2da   : > { %v2357_v22 = vadd.f32 %v4152_v39, %v2321_v17  ;;  %v2026_v25 = vadd.f32 %v1986_v58, %v1892_v18 }
 0x2dc   : > { %v2389_v28 = vmax.f32 %v2357_v22, 0.0 }
 0x2dd   : > { %v2282_v12 = vpop.f32.mrf.mxu0  ;;  %v2142_v57 = vpop.f32.mrf.mxu3 }
 0x2de   : > { %v2420_v14 = vadd.f32 %v2419_v31, %v2389_v28  ;;  %v2182_v24 = vadd.f32 %v2142_v57, %v2026_v25 }
 0x2e0   : > { %v2322_v60 = vadd.f32 %v2282_v12, %v2182_v24 }
 0x2e1   : > { %v1989_v34 = vpop.f32.mrf.mxu2 }
 0x2e2   : > { %v2358_v33 = vadd.f32 %v4152_v39, %v2322_v60  ;;  %v2027_v29 = vadd.f32 %v1989_v34, %v1893_v8 }
 0x2e4   : > { %v2390_v0 = vmax.f32 %v2358_v33, 0.0 }
 0x2e5   : > { %v2285_v50 = vpop.f32.mrf.mxu0  ;;  %v2145_v20 = vpop.f32.mrf.mxu3 }
 0x2e6   : > { %v2421_v32 = vadd.f32 %v2420_v14, %v2390_v0  ;;  %v2183_v53 = vadd.f32 %v2145_v20, %v2027_v29 }
 0x2e8   : > { %v2323_v42 = vadd.f32 %v2285_v50, %v2183_v53 }
 0x2e9   : > { %v1991_v41 = vpop.f32.mrf.mxu2 }
 0x2ea   : > { %v2359_v37 = vadd.f32 %v4152_v39, %v2323_v42  ;;  %v2028_v7 = vadd.f32 %v1991_v41, %v1894_v11 }
 0x2ec   : > { %v2391_v45 = vmax.f32 %v2359_v37, 0.0 }
 0x2ed   : > { %v2287_v13 = vpop.f32.mrf.mxu0  ;;  %v2147_v1 = vpop.f32.mrf.mxu3 }
 0x2ee   : > { %v2422_v35 = vadd.f32 %v2421_v32, %v2391_v45  ;;  %v2184_v52 = vadd.f32 %v2147_v1, %v2028_v7 }
 0x2f0   : > { %v2324_v51 = vadd.f32 %v2287_v13, %v2184_v52 }
 0x2f1   : > { %v1994_v47 = vpop.f32.mrf.mxu2 }
 0x2f2   : > { %v2360_v6 = vadd.f32 %v4152_v39, %v2324_v51  ;;  %v2029_v5 = vadd.f32 %v1994_v47, %v1895_v10 }
 0x2f4   : > { %v2392_v59 = vmax.f32 %v2360_v6, 0.0 }
 0x2f5   : > { %v2290_v54 = vpop.f32.mrf.mxu0  ;;  %v2150_v4 = vpop.f32.mrf.mxu3 }
 0x2f6   : > { %v2423_v30 = vadd.f32 %v2422_v35, %v2392_v59  ;;  %v2185_v40 = vadd.f32 %v2150_v4, %v2029_v5 }
 0x2f8   : > { %v2325_v61 = vadd.f32 %v2290_v54, %v2185_v40 }
 0x2f9   : > { %v1996_v23 = vpop.f32.mrf.mxu2 }
 0x2fa   : > { %v2361_v38 = vadd.f32 %v4152_v39, %v2325_v61  ;;  %v2030_v55 = vadd.f32 %v1996_v23, %v1896_v2 }
 0x2fc   : > { %v2393_v27 = vmax.f32 %v2361_v38, 0.0 }
 0x2fd   : > { %v2152_v16 = vpop.f32.mrf.mxu3  ;;  %v2292_v3 = vpop.f32.mrf.mxu0 }
 0x2fe   : > { %v2424_v15 = vadd.f32 %v2423_v30, %v2393_v27  ;;  %v2186_v63 = vadd.f32 %v2152_v16, %v2030_v55 }
 0x300   : > { %v2326_v43 = vadd.f32 %v2292_v3, %v2186_v63 }
 0x302   : > { %v2362_v26 = vadd.f32 %v4152_v39, %v2326_v43 }
 0x304   : > { %v2394_v19 = vmax.f32 %v2362_v26, 0.0 }
 0x306   : > { %v2425_v21 = vadd.f32 %v2424_v15, %v2394_v19 }
 0x308   : > { %v2426_v48 = vrot.slane %v2425_v21, 4 }
 0x30a   : > { %v2427_v31 = vadd.f32 %v2426_v48, %v2425_v21 }
 0x30c   : > { %v2428_v49 = vrot.slane %v2427_v31, 2 }
 0x30e   : > { %v2429_v62 = vadd.f32 %v2428_v49, %v2427_v31 }
 0x310   : > { %v2430_v18 = vrot.slane %v2429_v62, 1 }
 0x312   : > { %v2431_v17 = vadd.f32 %v2430_v18, %v2429_v62 }
 0x314   : > { %v2432_v58 = vmul.f32 0.00390625, %v2431_v17 }
 0x316   : > { %2467 = vmatmul.f32.vlgmr.msrb.gmra.mxu1 %v2432_v58  ;;  %2433 = vst [vmem:[%s247_s11] sm:$0x1] %v2432_v58 }
 0x317   : > { %2937 = shalt.err (!%p2934_p3)
}
 0x318   : > { %2857 = dma.vmem_to_hbm [thread:$0]  (%p3079_p5), %s2489_s12, 16, %s2491_s13, %s2474_s14   ;;  %v2450_v39 = vld [vmem:[%s4425_s4] sm:$0x1]  ;;  %vm2471_vm8 = vcmask 57344  }
 0x319   : > { %s2499_s10 = scalar_lea.hbm %s4427_s6, %s3062_s25  ;;  %s253_s15 = scalar_lea.vmem [#allocation4], %s4367_s26 }
 0x31a   : > { %s2501_s16 = sshll.u32 %s253_s15, 4  ;;  %s2503_s18 = sshll.u32 %s2499_s10, 4  ;;  %s2502_s16 = int_to_ptr.vmem [resolvable:$true] %s2501_s16  ;;  %s2504_s18 = int_to_ptr.hbm [resolvable:$true] %s2503_s18 }
 0x31b   : > { %s2478_s19 = scalar_lea.sflag [#allocation5], %s4367_s26  ;;  %s2952_s12 = sshra.s32 %s2504_s18, 4  ;;  %s2953_s12 = int_to_ptr.hbm [resolvable:$true] %s2952_s12 }
 0x31c   : > { %s2954_s13 = scalar_lea.hbm %s2953_s12, 1  ;;  %s2958_s20 = scalar_lea.hbm %s4427_s6, 2 }
 0x31d   : > { %p2955_p4 = scmp.ne.s32.totalorder %s2953_s12, %s2954_s13  ;;  %p2959_p9 = scmp.lt.s32.totalorder %s2953_s12, %s4427_s6 }
 0x31e   : > { %p2960_p10 = scmp.lt.s32.totalorder %s2958_s20, %s2954_s13 }
 0x31f   : > { %p2956_p7 = pnand %p2955_p4, %p3079_p5 }
 0x320   : > { %p2961_p11 = por %p2960_p10, %p2959_p9 }
 0x321   : > { %p2957_p8 = pneg %p2956_p7 }
 0x323   : > { %p2962_p12 = pnand %p2961_p11, %p2957_p8 }
 0x393   : > { %v2468_v22 = vpop.f32.mrf.mxu1 }
 0x394   : > { %v2469_v25 = vadd.f32 %v2468_v22, %v2450_v39 }
 0x396   : > { %2472 = vst.msk [vmem:[%s253_s15] sm:$0x1] %vm2471_vm8, %v2469_v25 }
 0x397   : > { %2965 = shalt.err (!%p2962_p12)
}
 0x398   : > { %2858 = dma.vmem_to_hbm [thread:$0]  (%p3079_p5), %s2502_s16, 16, %s2504_s18, %s2478_s19  }
 0x399 PF: > { %p2868_p13 = scmp.ge.s32.totalorder %s3004_s24, 2  ;;  %s2515_s26 = sand.u32 1, %s2992_s21  }
 0x39a   : > { %s2516_s9 = scalar_lea.sflag [#allocation3], %s2515_s26 }
 0x39b   : > { %p2862_p0 = pnand %p2868_p13, %p3083_p6 }
 0x39d   : > { %p2863_p1 = pneg %p2862_p0 }
 0x39f   : > { %2983 = dma.done.wait (%p2863_p1), %s2516_s9, 16  }
 0x3a0   : > { %2985 = vsyncadd (%p2863_p1), %s2516_s9, 4294967280  ;;  %s2525_s10 = scalar_lea.sflag [#allocation5], %s2515_s26 }
 0x3a1   : > { %2987 = dma.done.wait (%p2863_p1), %s2525_s10, 16  }
 0x3a2   : > { %2989 = vsyncadd (%p2863_p1), %s2525_s10, 4294967280  ;;  %p20_p5 = scmp.ge.s32.totalorder %s3066_s27, 4   ;;  %s4589_s21 = smov %s2996_s22 }
 0x3a3   : > { %s4590_s22 = smov %s3000_s23  ;;  %s4591_s23 = smov %s3077_s30 }
 0x3a4   : > { %s4592_s24 = smov %s3066_s27  ;;  %22 = sbr.rel (!%p20_p5) target bundleno = 5 (0x5), region = 100 }
 0x3a9   :  { %2530 = vsyncpa [#allocation3], 1 }
 0x3aa   :  { %2532 = vsyncpa [#allocation3 + $0x1], 1 }
 0x3ab   :  { %2533 = vsyncpa [#allocation5], 1 }
 0x3ac   :  { %2535 = vsyncpa [#allocation5 + $0x1], 1 }

</bundles_post_ra>
